<compile_context>
chip_gen: v5e
topology: v5e:2x2
jax: 0.10.0
libtpu: 0.0.40
codegen_flags: <defaults>
</compile_context>

<pallas_src>
import numpy as np
import jax
import jax.numpy as jnp
from jax.experimental import pallas as pl
from jax.experimental.pallas import tpu as pltpu


_PHASES = ((0, 0), (0, 1), (1, 0), (1, 1))  # 2x2 max-pool window offsets (dy, dx)
_K = 5                                      # conv kernel size
_PAD = _K // 2                              # 'same' padding
_CP = 8                                     # conv channel count (6) padded to 8 sublanes


# ----------------------------------------------------------------------------
# Fused kernel: conv1 -> relu -> pool -> conv2 -> relu -> pool -> flatten -> fc
# ----------------------------------------------------------------------------
def _make_fused_kernel(B, C2, S1, lpad):
    """Builds the fused kernel body.

    Static sizes:
      B     batch
      C2    conv2 output channels (6)
      S1    pooled-1 spatial size (img_size // 2)
      lpad  lane padding on each side of the staging scratch
    """
    per_img = S1 * S1          # lanes per image in the pooled-1/conv-2 raster
    NB = B * per_img           # lanes per phase block (=128 for B=2, img=16)

    def kernel(lhs1_ref, w1_ref, b1_ref, w2_ref, b2_ref, mask_ref,
               wfc_ref, bfc_ref, out_ref, stage_ref):
        f32 = jnp.float32

        # ---- conv1: one matmul covering all 4 pool phases -------------------
        # z1[c, phase*NB + (b, Y, X)] = conv1 pre-activation feeding pooled1[b, :, Y, X]
        z1 = jnp.dot(w1_ref[...], lhs1_ref[...], preferred_element_type=f32)   # (8, 4*NB)
        m1 = jnp.maximum(jnp.maximum(z1[:, 0:NB], z1[:, NB:2 * NB]),
                         jnp.maximum(z1[:, 2 * NB:3 * NB], z1[:, 3 * NB:4 * NB]))
        # bias + ReLU hoisted past the pool max (relu(max(x)+b) == max(relu(x+b))).
        h1 = jnp.maximum(m1 + b1_ref[...], 0.0)            # (8, NB) = pooled1, rows=c1

        # Stage pooled1 with zeroed lane borders: every conv2 tap becomes a plain
        # offset-window load (no scatter / im2col buffer).
        stage_ref[...] = jnp.zeros_like(stage_ref)
        stage_ref[:, lpad:lpad + NB] = h1

        # ---- conv2: 25 accumulating tap matmuls ------------------------------
        acc = jnp.zeros((_CP, NB), f32)
        for kh in range(_K):
            for kw in range(_K):
                t = kh * _K + kw
                s = S1 * (kh - _PAD) + (kw - _PAD)              # lane shift of this tap
                win = stage_ref[:, lpad + s:lpad + s + NB]       # (8, NB)
                x_tap = win * mask_ref[t:t + 1, :]               # zero invalid taps
                w_tap = w2_ref[8 * t:8 * t + 8, :]               # (8, 8) = w2[:, :, kh, kw]
                acc = acc + jnp.dot(w_tap, x_tap, preferred_element_type=f32)
        h2 = acc + b2_ref[...]                                   # (8, NB)

        # ---- 2x2 max pool via two shifted maxes (valid at even (y, x)) -------
        stage_ref[:, lpad:lpad + NB] = h2
        s1 = jnp.maximum(h2, stage_ref[:, lpad + 1:lpad + 1 + NB])
        stage_ref[:, lpad:lpad + NB] = s1
        s2 = jnp.maximum(s1, stage_ref[:, lpad + S1:lpad + S1 + NB])
        act = jnp.maximum(s2, 0.0)                               # (8, NB)

        # ---- fc: per (batch, channel) accumulating matmuls --------------------
        # Pooled-position selection and the NCHW flatten are folded into the
        # zero-expanded fc weight, so no relayout/scatter of `act` is needed.
        stage_ref[:, lpad:lpad + NB] = act
        for b in range(B):
            xb = stage_ref[:, lpad + b * per_img:lpad + (b + 1) * per_img]  # (8, S1*S1)
            logit = bfc_ref[...]                                            # (1, n_class)
            for c in range(C2):
                logit = logit + jnp.dot(
                    xb[c:c + 1, :], wfc_ref[c * per_img:(c + 1) * per_img, :],
                    preferred_element_type=f32)
            out_ref[b:b + 1, :] = logit

    return kernel


# ----------------------------------------------------------------------------
# Wrapper: conv1 im2col / weight prep (tiny XLA fusion) + single pallas_call
# ----------------------------------------------------------------------------
def simple_classifier_forward(x_nchw, params):
    """Matches SimpleClassifier.forward with n_cnn=2, n_fc=1, random_rotate=False."""
    # TODO(synk): RandomRotation and the n_fc==3 branch are not exercised by the
    # default forward and are not implemented.
    B, Cin, H, Wimg = x_nchw.shape
    assert H == Wimg and H % 4 == 0
    C1 = params["conv1_w"].shape[0]
    C2 = params["conv2_w"].shape[0]
    n_class = params["fc_w"].shape[0]
    S1 = H // 2                       # pooled-1 / conv2 spatial size
    S2 = H // 4                       # pooled-2 spatial size
    per_img = S1 * S1
    NB = B * per_img                  # lanes per phase block (128 here)
    D1 = _K * _K * Cin
    D1p = ((D1 + 7) // 8) * 8
    lpad = 2 * S1 + 8                 # staging-scratch lane padding (covers all shifts)
    f32 = jnp.float32

    # conv1 im2col, transposed: rows = (kh, kw, cin), columns = (phase, b, Y, X)
    # where (Y, X) index pooled-1 positions and phase is the 2x2 pool offset.
    x = jnp.transpose(x_nchw, (0, 2, 3, 1)).astype(f32)                     # NHWC
    xp = jnp.pad(x, ((0, 0), (_PAD, _PAD), (_PAD, _PAD), (0, 0)))
    patches = jnp.concatenate(
        [xp[:, kh:kh + H, kw:kw + H, :] for kh in range(_K) for kw in range(_K)],
        axis=-1)                                                            # (B,H,W,D1)
    blocks = []
    for dy, dx in _PHASES:
        sub = patches[:, dy::2, dx::2, :]                                   # (B,S1,S1,D1)
        blocks.append(sub.reshape(B * per_img, D1))
    lhs1 = jnp.concatenate(blocks, axis=0).T                                # (D1, 4*NB)
    lhs1 = jnp.pad(lhs1, ((0, D1p - D1), (0, 0))).astype(f32)

    # Weights / biases (tiny; constant-folded / fused by XLA).
    w1 = jnp.transpose(params["conv1_w"], (0, 2, 3, 1)).reshape(C1, D1)
    w1 = jnp.pad(w1, ((0, _CP - C1), (0, D1p - D1))).astype(f32)            # (8, D1p)
    b1 = jnp.pad(params["conv1_b"], (0, _CP - C1)).reshape(_CP, 1).astype(f32)

    w2 = jnp.transpose(params["conv2_w"], (2, 3, 0, 1))                     # (K,K,C2,C1)
    w2 = jnp.pad(w2, ((0, 0), (0, 0), (0, _CP - C2), (0, _CP - C1)))
    w2 = w2.reshape(_K * _K * _CP, _CP).astype(f32)                         # (200, 8)
    b2 = jnp.pad(params["conv2_b"], (0, _CP - C2)).reshape(_CP, 1).astype(f32)

    # Per-tap validity masks over the flattened (b, Y, X) lane raster: zero where
    # the 5x5 window falls outside the image or would wrap across a row / batch.
    idx = np.arange(NB)
    yy = (idx % per_img) // S1
    xx = idx % S1
    masks = np.zeros((_K * _K, NB), np.float32)
    for kh in range(_K):
        for kw in range(_K):
            dh, dw = kh - _PAD, kw - _PAD
            ok = (yy + dh >= 0) & (yy + dh < S1) & (xx + dw >= 0) & (xx + dw < S1)
            masks[kh * _K + kw] = ok.astype(np.float32)
    masks = jnp.asarray(masks)

    # fc weight, zero-expanded over the pre-pool (y, x) grid so the pooled-
    # position selection and the NCHW flatten happen inside the fc matmuls.
    fcw = params["fc_w"].T.reshape(C2, S2, S2, n_class).astype(f32)         # [c,i',j',n]
    wfc = jnp.zeros((C2, S1, S1, n_class), f32).at[:, ::2, ::2, :].set(fcw)
    wfc = wfc.reshape(C2 * per_img, n_class)                                # (384, n_class)
    bfc = params["fc_b"].reshape(1, n_class).astype(f32)

    kernel = _make_fused_kernel(B, C2, S1, lpad)
    grid_spec = pltpu.PrefetchScalarGridSpec(
        num_scalar_prefetch=0,
        grid=(1,),                                     # whole problem in one step
        in_specs=[
            pl.BlockSpec((D1p, 4 * NB), lambda i: (0, 0)),
            pl.BlockSpec((_CP, D1p), lambda i: (0, 0)),
            pl.BlockSpec((_CP, 1), lambda i: (0, 0)),
            pl.BlockSpec((_K * _K * _CP, _CP), lambda i: (0, 0)),
            pl.BlockSpec((_CP, 1), lambda i: (0, 0)),
            pl.BlockSpec((_K * _K, NB), lambda i: (0, 0)),
            pl.BlockSpec((C2 * per_img, n_class), lambda i: (0, 0)),
            pl.BlockSpec((1, n_class), lambda i: (0, 0)),
        ],
        out_specs=pl.BlockSpec((B, n_class), lambda i: (0, 0)),
        scratch_shapes=[
            pltpu.VMEM((_CP, NB + 2 * lpad), jnp.float32),   # zero-bordered staging row
        ],
    )
    return pl.pallas_call(
        kernel,
        out_shape=jax.ShapeDtypeStruct((B, n_class), jnp.float32),
        grid_spec=grid_spec,
        compiler_params=pltpu.CompilerParams(
            dimension_semantics=("arbitrary",)),
    )(lhs1, w1, b1, w2, b2, masks, wfc, bfc)


# ----------------------------------------------------------------------------
# Pure-JAX reference (full f32 precision) for the correctness check
# ----------------------------------------------------------------------------
def reference_forward(x_nchw, params):
    def conv(x, w, b):
        y = jax.lax.conv_general_dilated(
            x, w, (1, 1), ((2, 2), (2, 2)),
            dimension_numbers=("NCHW", "OIHW", "NCHW"),
            precision=jax.lax.Precision.HIGHEST)
        return y + b[None, :, None, None]

    def pool(x):
        return jax.lax.reduce_window(x, -jnp.inf, jax.lax.max,
                                     (1, 1, 2, 2), (1, 1, 2, 2), "VALID")

    h = x_nchw
    h = pool(jnp.maximum(conv(h, params["conv1_w"], params["conv1_b"]), 0.0))
    h = pool(jnp.maximum(conv(h, params["conv2_w"], params["conv2_b"]), 0.0))
    flat = h.reshape(h.shape[0], -1)
    return jnp.dot(flat, params["fc_w"].T,
                   precision=jax.lax.Precision.HIGHEST) + params["fc_b"]


# ----------------------------------------------------------------------------
if __name__ == "__main__":
    B, CIN, IMG, NCLASS = 2, 4, 16, 10            # small shapes, img_size=16
    N_CNN = 2
    conv2d_size = (IMG // 2 ** N_CNN) ** 2 * 6    # = 96

    key = jax.random.PRNGKey(0)
    k = jax.random.split(key, 7)
    x_nchw = jax.random.normal(k[0], (B, CIN, IMG, IMG), jnp.float32)

    params = {
        "conv1_w": 0.1 * jax.random.normal(k[1], (6, CIN, 5, 5), jnp.float32),
        "conv1_b": 0.1 * jax.random.normal(k[2], (6,), jnp.float32),
        "conv2_w": 0.1 * jax.random.normal(k[3], (6, 6, 5, 5), jnp.float32),
        "conv2_b": 0.1 * jax.random.normal(k[4], (6,), jnp.float32),
        "fc_w": 0.1 * jax.random.normal(k[5], (NCLASS, conv2d_size), jnp.float32),
        "fc_b": 0.1 * jax.random.normal(k[6], (NCLASS,), jnp.float32),
    }

    fwd = jax.jit(simple_classifier_forward)
    logits = fwd(x_nchw, params)
    jax.block_until_ready(logits)
    assert logits.shape == (B, NCLASS)

    ref = jax.jit(reference_forward)(x_nchw, params)
    err = float(jnp.max(jnp.abs(logits - ref)))
    # Operands are f32; the tolerance covers the worst case where the MXU still
    # runs single-pass bf16 at default precision (observed error is far smaller).
    assert jnp.allclose(logits, ref, atol=4e-2, rtol=4e-2), f"max err {err}"

    print("KERNEL_OK")
</pallas_src>

<mosaic_0001>
module attributes {stable_mosaic.version = 11 : i64} {
  func.func @kernel(%arg0: i32, %arg1: memref<104x512xf32, #tpu.memory_space<vmem>>, %arg2: memref<8x104xf32, #tpu.memory_space<vmem>>, %arg3: memref<8x1xf32, #tpu.memory_space<vmem>>, %arg4: memref<200x8xf32, #tpu.memory_space<vmem>>, %arg5: memref<8x1xf32, #tpu.memory_space<vmem>>, %arg6: memref<25x128xf32, #tpu.memory_space<vmem>>, %arg7: memref<384x10xf32, #tpu.memory_space<vmem>>, %arg8: memref<1x10xf32, #tpu.memory_space<vmem>>, %arg9: memref<2x10xf32, #tpu.memory_space<vmem>>, %arg10: memref<8x176xf32, #tpu.memory_space<vmem>>) attributes {dimension_semantics = [#tpu.dimension_semantics<arbitrary>], iteration_bounds = array<i64: 1>, scalar_prefetch = 0 : i64, scratch_operands = 1 : i64, tpu.core_type = #tpu.core_type<tc>, window_params = [{pipeline_mode = #tpu.pipeline_mode<synchronous>, transform_indices = @transform_0, window_bounds = array<i64: 104, 512>}, {pipeline_mode = #tpu.pipeline_mode<synchronous>, transform_indices = @transform_1, window_bounds = array<i64: 8, 104>}, {pipeline_mode = #tpu.pipeline_mode<synchronous>, transform_indices = @transform_2, window_bounds = array<i64: 8, 1>}, {pipeline_mode = #tpu.pipeline_mode<synchronous>, transform_indices = @transform_3, window_bounds = array<i64: 200, 8>}, {pipeline_mode = #tpu.pipeline_mode<synchronous>, transform_indices = @transform_4, window_bounds = array<i64: 8, 1>}, {pipeline_mode = #tpu.pipeline_mode<synchronous>, transform_indices = @transform_5, window_bounds = array<i64: 25, 128>}, {pipeline_mode = #tpu.pipeline_mode<synchronous>, transform_indices = @transform_6, window_bounds = array<i64: 384, 10>}, {pipeline_mode = #tpu.pipeline_mode<synchronous>, transform_indices = @transform_7, window_bounds = array<i64: 1, 10>}, {pipeline_mode = #tpu.pipeline_mode<synchronous>, transform_indices = @transform_8, window_bounds = array<i64: 2, 10>}]} {
    %c0 = arith.constant 0 : index
    %c0_0 = arith.constant 0 : index
    %0 = vector.load %arg2[%c0, %c0_0] : memref<8x104xf32, #tpu.memory_space<vmem>>, vector<8x104xf32>
    %c0_1 = arith.constant 0 : index
    %c0_2 = arith.constant 0 : index
    %1 = vector.load %arg1[%c0_1, %c0_2] : memref<104x512xf32, #tpu.memory_space<vmem>>, vector<104x512xf32>
    %cst = arith.constant dense<0.000000e+00> : vector<8x512xf32>
    %2 = tpu.matmul %0, %1, %cst {dimension_numbers = #tpu.dot_dimension_numbers<[1], [0], [0], [1], [0, 0, 1, 1], [], []>} : vector<8x104xf32>, vector<104x512xf32>, vector<8x512xf32> -> vector<8x512xf32>
    %3 = vector.extract_strided_slice %2 {offsets = [0, 0], sizes = [8, 128], strides = [1, 1]} : vector<8x512xf32> to vector<8x128xf32>
    %4 = vector.extract_strided_slice %2 {offsets = [0, 128], sizes = [8, 128], strides = [1, 1]} : vector<8x512xf32> to vector<8x128xf32>
    %5 = arith.maximumf %3, %4 : vector<8x128xf32>
    %6 = vector.extract_strided_slice %2 {offsets = [0, 256], sizes = [8, 128], strides = [1, 1]} : vector<8x512xf32> to vector<8x128xf32>
    %7 = vector.extract_strided_slice %2 {offsets = [0, 384], sizes = [8, 128], strides = [1, 1]} : vector<8x512xf32> to vector<8x128xf32>
    %8 = arith.maximumf %6, %7 : vector<8x128xf32>
    %9 = arith.maximumf %5, %8 : vector<8x128xf32>
    %c0_3 = arith.constant 0 : index
    %c0_4 = arith.constant 0 : index
    %10 = vector.load %arg3[%c0_3, %c0_4] : memref<8x1xf32, #tpu.memory_space<vmem>>, vector<8x1xf32>
    %11 = vector.broadcast %10 : vector<8x1xf32> to vector<8x128xf32>
    %12 = arith.addf %9, %11 : vector<8x128xf32>
    %cst_5 = arith.constant 0.000000e+00 : f32
    %13 = vector.broadcast %cst_5 : f32 to vector<8x128xf32>
    %14 = arith.maximumf %12, %13 : vector<8x128xf32>
    %cst_6 = arith.constant 0.000000e+00 : f32
    %15 = vector.broadcast %cst_6 : f32 to vector<8x176xf32>
    %c0_7 = arith.constant 0 : index
    %c0_8 = arith.constant 0 : index
    %16 = vector.load %arg10[%c0_7, %c0_8] : memref<8x176xf32, #tpu.memory_space<vmem>>, vector<8x176xf32>
    tpu.vector_store %arg10[%c0_7, %c0_8], %15 {strides = array<i32>} : memref<8x176xf32, #tpu.memory_space<vmem>>, vector<8x176xf32>,
    %c0_9 = arith.constant 0 : index
    %c24 = arith.constant 24 : index
    %17 = vector.load %arg10[%c0_9, %c24] : memref<8x176xf32, #tpu.memory_space<vmem>>, vector<8x128xf32>
    tpu.vector_store %arg10[%c0_9, %c24], %14 {strides = array<i32>} : memref<8x176xf32, #tpu.memory_space<vmem>>, vector<8x128xf32>,
    %cst_10 = arith.constant 0.000000e+00 : f32
    %18 = vector.broadcast %cst_10 : f32 to vector<8x128xf32>
    %c0_11 = arith.constant 0 : index
    %c6 = arith.constant 6 : index
    %19 = vector.load %arg10[%c0_11, %c6] : memref<8x176xf32, #tpu.memory_space<vmem>>, vector<8x128xf32>
    %c0_12 = arith.constant 0 : index
    %c0_13 = arith.constant 0 : index
    %20 = vector.load %arg6[%c0_12, %c0_13] : memref<25x128xf32, #tpu.memory_space<vmem>>, vector<1x128xf32>
    %21 = vector.broadcast %20 : vector<1x128xf32> to vector<8x128xf32>
    %22 = arith.mulf %19, %21 : vector<8x128xf32>
    %c0_14 = arith.constant 0 : index
    %c0_15 = arith.constant 0 : index
    %23 = vector.load %arg4[%c0_14, %c0_15] : memref<200x8xf32, #tpu.memory_space<vmem>>, vector<8x8xf32>
    %cst_16 = arith.constant dense<0.000000e+00> : vector<8x128xf32>
    %24 = tpu.matmul %23, %22, %cst_16 {dimension_numbers = #tpu.dot_dimension_numbers<[1], [0], [0], [1], [0, 0, 1, 1], [], []>} : vector<8x8xf32>, vector<8x128xf32>, vector<8x128xf32> -> vector<8x128xf32>
    %25 = arith.addf %18, %24 : vector<8x128xf32>
    %c0_17 = arith.constant 0 : index
    %c7 = arith.constant 7 : index
    %26 = vector.load %arg10[%c0_17, %c7] : memref<8x176xf32, #tpu.memory_space<vmem>>, vector<8x128xf32>
    %c1 = arith.constant 1 : index
    %c0_18 = arith.constant 0 : index
    %27 = vector.load %arg6[%c1, %c0_18] : memref<25x128xf32, #tpu.memory_space<vmem>>, vector<1x128xf32>
    %28 = vector.broadcast %27 : vector<1x128xf32> to vector<8x128xf32>
    %29 = arith.mulf %26, %28 : vector<8x128xf32>
    %c8 = arith.constant 8 : index
    %c0_19 = arith.constant 0 : index
    %30 = vector.load %arg4[%c8, %c0_19] : memref<200x8xf32, #tpu.memory_space<vmem>>, vector<8x8xf32>
    %cst_20 = arith.constant dense<0.000000e+00> : vector<8x128xf32>
    %31 = tpu.matmul %30, %29, %cst_20 {dimension_numbers = #tpu.dot_dimension_numbers<[1], [0], [0], [1], [0, 0, 1, 1], [], []>} : vector<8x8xf32>, vector<8x128xf32>, vector<8x128xf32> -> vector<8x128xf32>
    %32 = arith.addf %25, %31 : vector<8x128xf32>
    %c0_21 = arith.constant 0 : index
    %c8_22 = arith.constant 8 : index
    %33 = vector.load %arg10[%c0_21, %c8_22] : memref<8x176xf32, #tpu.memory_space<vmem>>, vector<8x128xf32>
    %c2 = arith.constant 2 : index
    %c0_23 = arith.constant 0 : index
    %34 = vector.load %arg6[%c2, %c0_23] : memref<25x128xf32, #tpu.memory_space<vmem>>, vector<1x128xf32>
    %35 = vector.broadcast %34 : vector<1x128xf32> to vector<8x128xf32>
    %36 = arith.mulf %33, %35 : vector<8x128xf32>
    %c16 = arith.constant 16 : index
    %c0_24 = arith.constant 0 : index
    %37 = vector.load %arg4[%c16, %c0_24] : memref<200x8xf32, #tpu.memory_space<vmem>>, vector<8x8xf32>
    %cst_25 = arith.constant dense<0.000000e+00> : vector<8x128xf32>
    %38 = tpu.matmul %37, %36, %cst_25 {dimension_numbers = #tpu.dot_dimension_numbers<[1], [0], [0], [1], [0, 0, 1, 1], [], []>} : vector<8x8xf32>, vector<8x128xf32>, vector<8x128xf32> -> vector<8x128xf32>
    %39 = arith.addf %32, %38 : vector<8x128xf32>
    %c0_26 = arith.constant 0 : index
    %c9 = arith.constant 9 : index
    %40 = vector.load %arg10[%c0_26, %c9] : memref<8x176xf32, #tpu.memory_space<vmem>>, vector<8x128xf32>
    %c3 = arith.constant 3 : index
    %c0_27 = arith.constant 0 : index
    %41 = vector.load %arg6[%c3, %c0_27] : memref<25x128xf32, #tpu.memory_space<vmem>>, vector<1x128xf32>
    %42 = vector.broadcast %41 : vector<1x128xf32> to vector<8x128xf32>
    %43 = arith.mulf %40, %42 : vector<8x128xf32>
    %c24_28 = arith.constant 24 : index
    %c0_29 = arith.constant 0 : index
    %44 = vector.load %arg4[%c24_28, %c0_29] : memref<200x8xf32, #tpu.memory_space<vmem>>, vector<8x8xf32>
    %cst_30 = arith.constant dense<0.000000e+00> : vector<8x128xf32>
    %45 = tpu.matmul %44, %43, %cst_30 {dimension_numbers = #tpu.dot_dimension_numbers<[1], [0], [0], [1], [0, 0, 1, 1], [], []>} : vector<8x8xf32>, vector<8x128xf32>, vector<8x128xf32> -> vector<8x128xf32>
    %46 = arith.addf %39, %45 : vector<8x128xf32>
    %c0_31 = arith.constant 0 : index
    %c10 = arith.constant 10 : index
    %47 = vector.load %arg10[%c0_31, %c10] : memref<8x176xf32, #tpu.memory_space<vmem>>, vector<8x128xf32>
    %c4 = arith.constant 4 : index
    %c0_32 = arith.constant 0 : index
    %48 = vector.load %arg6[%c4, %c0_32] : memref<25x128xf32, #tpu.memory_space<vmem>>, vector<1x128xf32>
    %49 = vector.broadcast %48 : vector<1x128xf32> to vector<8x128xf32>
    %50 = arith.mulf %47, %49 : vector<8x128xf32>
    %c32 = arith.constant 32 : index
    %c0_33 = arith.constant 0 : index
    %51 = vector.load %arg4[%c32, %c0_33] : memref<200x8xf32, #tpu.memory_space<vmem>>, vector<8x8xf32>
    %cst_34 = arith.constant dense<0.000000e+00> : vector<8x128xf32>
    %52 = tpu.matmul %51, %50, %cst_34 {dimension_numbers = #tpu.dot_dimension_numbers<[1], [0], [0], [1], [0, 0, 1, 1], [], []>} : vector<8x8xf32>, vector<8x128xf32>, vector<8x128xf32> -> vector<8x128xf32>
    %53 = arith.addf %46, %52 : vector<8x128xf32>
    %c0_35 = arith.constant 0 : index
    %c14 = arith.constant 14 : index
    %54 = vector.load %arg10[%c0_35, %c14] : memref<8x176xf32, #tpu.memory_space<vmem>>, vector<8x128xf32>
    %c5 = arith.constant 5 : index
    %c0_36 = arith.constant 0 : index
    %55 = vector.load %arg6[%c5, %c0_36] : memref<25x128xf32, #tpu.memory_space<vmem>>, vector<1x128xf32>
    %56 = vector.broadcast %55 : vector<1x128xf32> to vector<8x128xf32>
    %57 = arith.mulf %54, %56 : vector<8x128xf32>
    %c40 = arith.constant 40 : index
    %c0_37 = arith.constant 0 : index
    %58 = vector.load %arg4[%c40, %c0_37] : memref<200x8xf32, #tpu.memory_space<vmem>>, vector<8x8xf32>
    %cst_38 = arith.constant dense<0.000000e+00> : vector<8x128xf32>
    %59 = tpu.matmul %58, %57, %cst_38 {dimension_numbers = #tpu.dot_dimension_numbers<[1], [0], [0], [1], [0, 0, 1, 1], [], []>} : vector<8x8xf32>, vector<8x128xf32>, vector<8x128xf32> -> vector<8x128xf32>
    %60 = arith.addf %53, %59 : vector<8x128xf32>
    %c0_39 = arith.constant 0 : index
    %c15 = arith.constant 15 : index
    %61 = vector.load %arg10[%c0_39, %c15] : memref<8x176xf32, #tpu.memory_space<vmem>>, vector<8x128xf32>
    %c6_40 = arith.constant 6 : index
    %c0_41 = arith.constant 0 : index
    %62 = vector.load %arg6[%c6_40, %c0_41] : memref<25x128xf32, #tpu.memory_space<vmem>>, vector<1x128xf32>
    %63 = vector.broadcast %62 : vector<1x128xf32> to vector<8x128xf32>
    %64 = arith.mulf %61, %63 : vector<8x128xf32>
    %c48 = arith.constant 48 : index
    %c0_42 = arith.constant 0 : index
    %65 = vector.load %arg4[%c48, %c0_42] : memref<200x8xf32, #tpu.memory_space<vmem>>, vector<8x8xf32>
    %cst_43 = arith.constant dense<0.000000e+00> : vector<8x128xf32>
    %66 = tpu.matmul %65, %64, %cst_43 {dimension_numbers = #tpu.dot_dimension_numbers<[1], [0], [0], [1], [0, 0, 1, 1], [], []>} : vector<8x8xf32>, vector<8x128xf32>, vector<8x128xf32> -> vector<8x128xf32>
    %67 = arith.addf %60, %66 : vector<8x128xf32>
    %c0_44 = arith.constant 0 : index
    %c16_45 = arith.constant 16 : index
    %68 = vector.load %arg10[%c0_44, %c16_45] : memref<8x176xf32, #tpu.memory_space<vmem>>, vector<8x128xf32>
    %c7_46 = arith.constant 7 : index
    %c0_47 = arith.constant 0 : index
    %69 = vector.load %arg6[%c7_46, %c0_47] : memref<25x128xf32, #tpu.memory_space<vmem>>, vector<1x128xf32>
    %70 = vector.broadcast %69 : vector<1x128xf32> to vector<8x128xf32>
    %71 = arith.mulf %68, %70 : vector<8x128xf32>
    %c56 = arith.constant 56 : index
    %c0_48 = arith.constant 0 : index
    %72 = vector.load %arg4[%c56, %c0_48] : memref<200x8xf32, #tpu.memory_space<vmem>>, vector<8x8xf32>
    %cst_49 = arith.constant dense<0.000000e+00> : vector<8x128xf32>
    %73 = tpu.matmul %72, %71, %cst_49 {dimension_numbers = #tpu.dot_dimension_numbers<[1], [0], [0], [1], [0, 0, 1, 1], [], []>} : vector<8x8xf32>, vector<8x128xf32>, vector<8x128xf32> -> vector<8x128xf32>
    %74 = arith.addf %67, %73 : vector<8x128xf32>
    %c0_50 = arith.constant 0 : index
    %c17 = arith.constant 17 : index
    %75 = vector.load %arg10[%c0_50, %c17] : memref<8x176xf32, #tpu.memory_space<vmem>>, vector<8x128xf32>
    %c8_51 = arith.constant 8 : index
    %c0_52 = arith.constant 0 : index
    %76 = vector.load %arg6[%c8_51, %c0_52] : memref<25x128xf32, #tpu.memory_space<vmem>>, vector<1x128xf32>
    %77 = vector.broadcast %76 : vector<1x128xf32> to vector<8x128xf32>
    %78 = arith.mulf %75, %77 : vector<8x128xf32>
    %c64 = arith.constant 64 : index
    %c0_53 = arith.constant 0 : index
    %79 = vector.load %arg4[%c64, %c0_53] : memref<200x8xf32, #tpu.memory_space<vmem>>, vector<8x8xf32>
    %cst_54 = arith.constant dense<0.000000e+00> : vector<8x128xf32>
    %80 = tpu.matmul %79, %78, %cst_54 {dimension_numbers = #tpu.dot_dimension_numbers<[1], [0], [0], [1], [0, 0, 1, 1], [], []>} : vector<8x8xf32>, vector<8x128xf32>, vector<8x128xf32> -> vector<8x128xf32>
    %81 = arith.addf %74, %80 : vector<8x128xf32>
    %c0_55 = arith.constant 0 : index
    %c18 = arith.constant 18 : index
    %82 = vector.load %arg10[%c0_55, %c18] : memref<8x176xf32, #tpu.memory_space<vmem>>, vector<8x128xf32>
    %c9_56 = arith.constant 9 : index
    %c0_57 = arith.constant 0 : index
    %83 = vector.load %arg6[%c9_56, %c0_57] : memref<25x128xf32, #tpu.memory_space<vmem>>, vector<1x128xf32>
    %84 = vector.broadcast %83 : vector<1x128xf32> to vector<8x128xf32>
    %85 = arith.mulf %82, %84 : vector<8x128xf32>
    %c72 = arith.constant 72 : index
    %c0_58 = arith.constant 0 : index
    %86 = vector.load %arg4[%c72, %c0_58] : memref<200x8xf32, #tpu.memory_space<vmem>>, vector<8x8xf32>
    %cst_59 = arith.constant dense<0.000000e+00> : vector<8x128xf32>
    %87 = tpu.matmul %86, %85, %cst_59 {dimension_numbers = #tpu.dot_dimension_numbers<[1], [0], [0], [1], [0, 0, 1, 1], [], []>} : vector<8x8xf32>, vector<8x128xf32>, vector<8x128xf32> -> vector<8x128xf32>
    %88 = arith.addf %81, %87 : vector<8x128xf32>
    %c0_60 = arith.constant 0 : index
    %c22 = arith.constant 22 : index
    %89 = vector.load %arg10[%c0_60, %c22] : memref<8x176xf32, #tpu.memory_space<vmem>>, vector<8x128xf32>
    %c10_61 = arith.constant 10 : index
    %c0_62 = arith.constant 0 : index
    %90 = vector.load %arg6[%c10_61, %c0_62] : memref<25x128xf32, #tpu.memory_space<vmem>>, vector<1x128xf32>
    %91 = vector.broadcast %90 : vector<1x128xf32> to vector<8x128xf32>
    %92 = arith.mulf %89, %91 : vector<8x128xf32>
    %c80 = arith.constant 80 : index
    %c0_63 = arith.constant 0 : index
    %93 = vector.load %arg4[%c80, %c0_63] : memref<200x8xf32, #tpu.memory_space<vmem>>, vector<8x8xf32>
    %cst_64 = arith.constant dense<0.000000e+00> : vector<8x128xf32>
    %94 = tpu.matmul %93, %92, %cst_64 {dimension_numbers = #tpu.dot_dimension_numbers<[1], [0], [0], [1], [0, 0, 1, 1], [], []>} : vector<8x8xf32>, vector<8x128xf32>, vector<8x128xf32> -> vector<8x128xf32>
    %95 = arith.addf %88, %94 : vector<8x128xf32>
    %c0_65 = arith.constant 0 : index
    %c23 = arith.constant 23 : index
    %96 = vector.load %arg10[%c0_65, %c23] : memref<8x176xf32, #tpu.memory_space<vmem>>, vector<8x128xf32>
    %c11 = arith.constant 11 : index
    %c0_66 = arith.constant 0 : index
    %97 = vector.load %arg6[%c11, %c0_66] : memref<25x128xf32, #tpu.memory_space<vmem>>, vector<1x128xf32>
    %98 = vector.broadcast %97 : vector<1x128xf32> to vector<8x128xf32>
    %99 = arith.mulf %96, %98 : vector<8x128xf32>
    %c88 = arith.constant 88 : index
    %c0_67 = arith.constant 0 : index
    %100 = vector.load %arg4[%c88, %c0_67] : memref<200x8xf32, #tpu.memory_space<vmem>>, vector<8x8xf32>
    %cst_68 = arith.constant dense<0.000000e+00> : vector<8x128xf32>
    %101 = tpu.matmul %100, %99, %cst_68 {dimension_numbers = #tpu.dot_dimension_numbers<[1], [0], [0], [1], [0, 0, 1, 1], [], []>} : vector<8x8xf32>, vector<8x128xf32>, vector<8x128xf32> -> vector<8x128xf32>
    %102 = arith.addf %95, %101 : vector<8x128xf32>
    %c0_69 = arith.constant 0 : index
    %c24_70 = arith.constant 24 : index
    %103 = vector.load %arg10[%c0_69, %c24_70] : memref<8x176xf32, #tpu.memory_space<vmem>>, vector<8x128xf32>
    %c12 = arith.constant 12 : index
    %c0_71 = arith.constant 0 : index
    %104 = vector.load %arg6[%c12, %c0_71] : memref<25x128xf32, #tpu.memory_space<vmem>>, vector<1x128xf32>
    %105 = vector.broadcast %104 : vector<1x128xf32> to vector<8x128xf32>
    %106 = arith.mulf %103, %105 : vector<8x128xf32>
    %c96 = arith.constant 96 : index
    %c0_72 = arith.constant 0 : index
    %107 = vector.load %arg4[%c96, %c0_72] : memref<200x8xf32, #tpu.memory_space<vmem>>, vector<8x8xf32>
    %cst_73 = arith.constant dense<0.000000e+00> : vector<8x128xf32>
    %108 = tpu.matmul %107, %106, %cst_73 {dimension_numbers = #tpu.dot_dimension_numbers<[1], [0], [0], [1], [0, 0, 1, 1], [], []>} : vector<8x8xf32>, vector<8x128xf32>, vector<8x128xf32> -> vector<8x128xf32>
    %109 = arith.addf %102, %108 : vector<8x128xf32>
    %c0_74 = arith.constant 0 : index
    %c25 = arith.constant 25 : index
    %110 = vector.load %arg10[%c0_74, %c25] : memref<8x176xf32, #tpu.memory_space<vmem>>, vector<8x128xf32>
    %c13 = arith.constant 13 : index
    %c0_75 = arith.constant 0 : index
    %111 = vector.load %arg6[%c13, %c0_75] : memref<25x128xf32, #tpu.memory_space<vmem>>, vector<1x128xf32>
    %112 = vector.broadcast %111 : vector<1x128xf32> to vector<8x128xf32>
    %113 = arith.mulf %110, %112 : vector<8x128xf32>
    %c104 = arith.constant 104 : index
    %c0_76 = arith.constant 0 : index
    %114 = vector.load %arg4[%c104, %c0_76] : memref<200x8xf32, #tpu.memory_space<vmem>>, vector<8x8xf32>
    %cst_77 = arith.constant dense<0.000000e+00> : vector<8x128xf32>
    %115 = tpu.matmul %114, %113, %cst_77 {dimension_numbers = #tpu.dot_dimension_numbers<[1], [0], [0], [1], [0, 0, 1, 1], [], []>} : vector<8x8xf32>, vector<8x128xf32>, vector<8x128xf32> -> vector<8x128xf32>
    %116 = arith.addf %109, %115 : vector<8x128xf32>
    %c0_78 = arith.constant 0 : index
    %c26 = arith.constant 26 : index
    %117 = vector.load %arg10[%c0_78, %c26] : memref<8x176xf32, #tpu.memory_space<vmem>>, vector<8x128xf32>
    %c14_79 = arith.constant 14 : index
    %c0_80 = arith.constant 0 : index
    %118 = vector.load %arg6[%c14_79, %c0_80] : memref<25x128xf32, #tpu.memory_space<vmem>>, vector<1x128xf32>
    %119 = vector.broadcast %118 : vector<1x128xf32> to vector<8x128xf32>
    %120 = arith.mulf %117, %119 : vector<8x128xf32>
    %c112 = arith.constant 112 : index
    %c0_81 = arith.constant 0 : index
    %121 = vector.load %arg4[%c112, %c0_81] : memref<200x8xf32, #tpu.memory_space<vmem>>, vector<8x8xf32>
    %cst_82 = arith.constant dense<0.000000e+00> : vector<8x128xf32>
    %122 = tpu.matmul %121, %120, %cst_82 {dimension_numbers = #tpu.dot_dimension_numbers<[1], [0], [0], [1], [0, 0, 1, 1], [], []>} : vector<8x8xf32>, vector<8x128xf32>, vector<8x128xf32> -> vector<8x128xf32>
    %123 = arith.addf %116, %122 : vector<8x128xf32>
    %c0_83 = arith.constant 0 : index
    %c30 = arith.constant 30 : index
    %124 = vector.load %arg10[%c0_83, %c30] : memref<8x176xf32, #tpu.memory_space<vmem>>, vector<8x128xf32>
    %c15_84 = arith.constant 15 : index
    %c0_85 = arith.constant 0 : index
    %125 = vector.load %arg6[%c15_84, %c0_85] : memref<25x128xf32, #tpu.memory_space<vmem>>, vector<1x128xf32>
    %126 = vector.broadcast %125 : vector<1x128xf32> to vector<8x128xf32>
    %127 = arith.mulf %124, %126 : vector<8x128xf32>
    %c120 = arith.constant 120 : index
    %c0_86 = arith.constant 0 : index
    %128 = vector.load %arg4[%c120, %c0_86] : memref<200x8xf32, #tpu.memory_space<vmem>>, vector<8x8xf32>
    %cst_87 = arith.constant dense<0.000000e+00> : vector<8x128xf32>
    %129 = tpu.matmul %128, %127, %cst_87 {dimension_numbers = #tpu.dot_dimension_numbers<[1], [0], [0], [1], [0, 0, 1, 1], [], []>} : vector<8x8xf32>, vector<8x128xf32>, vector<8x128xf32> -> vector<8x128xf32>
    %130 = arith.addf %123, %129 : vector<8x128xf32>
    %c0_88 = arith.constant 0 : index
    %c31 = arith.constant 31 : index
    %131 = vector.load %arg10[%c0_88, %c31] : memref<8x176xf32, #tpu.memory_space<vmem>>, vector<8x128xf32>
    %c16_89 = arith.constant 16 : index
    %c0_90 = arith.constant 0 : index
    %132 = vector.load %arg6[%c16_89, %c0_90] : memref<25x128xf32, #tpu.memory_space<vmem>>, vector<1x128xf32>
    %133 = vector.broadcast %132 : vector<1x128xf32> to vector<8x128xf32>
    %134 = arith.mulf %131, %133 : vector<8x128xf32>
    %c128 = arith.constant 128 : index
    %c0_91 = arith.constant 0 : index
    %135 = vector.load %arg4[%c128, %c0_91] : memref<200x8xf32, #tpu.memory_space<vmem>>, vector<8x8xf32>
    %cst_92 = arith.constant dense<0.000000e+00> : vector<8x128xf32>
    %136 = tpu.matmul %135, %134, %cst_92 {dimension_numbers = #tpu.dot_dimension_numbers<[1], [0], [0], [1], [0, 0, 1, 1], [], []>} : vector<8x8xf32>, vector<8x128xf32>, vector<8x128xf32> -> vector<8x128xf32>
    %137 = arith.addf %130, %136 : vector<8x128xf32>
    %c0_93 = arith.constant 0 : index
    %c32_94 = arith.constant 32 : index
    %138 = vector.load %arg10[%c0_93, %c32_94] : memref<8x176xf32, #tpu.memory_space<vmem>>, vector<8x128xf32>
    %c17_95 = arith.constant 17 : index
    %c0_96 = arith.constant 0 : index
    %139 = vector.load %arg6[%c17_95, %c0_96] : memref<25x128xf32, #tpu.memory_space<vmem>>, vector<1x128xf32>
    %140 = vector.broadcast %139 : vector<1x128xf32> to vector<8x128xf32>
    %141 = arith.mulf %138, %140 : vector<8x128xf32>
    %c136 = arith.constant 136 : index
    %c0_97 = arith.constant 0 : index
    %142 = vector.load %arg4[%c136, %c0_97] : memref<200x8xf32, #tpu.memory_space<vmem>>, vector<8x8xf32>
    %cst_98 = arith.constant dense<0.000000e+00> : vector<8x128xf32>
    %143 = tpu.matmul %142, %141, %cst_98 {dimension_numbers = #tpu.dot_dimension_numbers<[1], [0], [0], [1], [0, 0, 1, 1], [], []>} : vector<8x8xf32>, vector<8x128xf32>, vector<8x128xf32> -> vector<8x128xf32>
    %144 = arith.addf %137, %143 : vector<8x128xf32>
    %c0_99 = arith.constant 0 : index
    %c33 = arith.constant 33 : index
    %145 = vector.load %arg10[%c0_99, %c33] : memref<8x176xf32, #tpu.memory_space<vmem>>, vector<8x128xf32>
    %c18_100 = arith.constant 18 : index
    %c0_101 = arith.constant 0 : index
    %146 = vector.load %arg6[%c18_100, %c0_101] : memref<25x128xf32, #tpu.memory_space<vmem>>, vector<1x128xf32>
    %147 = vector.broadcast %146 : vector<1x128xf32> to vector<8x128xf32>
    %148 = arith.mulf %145, %147 : vector<8x128xf32>
    %c144 = arith.constant 144 : index
    %c0_102 = arith.constant 0 : index
    %149 = vector.load %arg4[%c144, %c0_102] : memref<200x8xf32, #tpu.memory_space<vmem>>, vector<8x8xf32>
    %cst_103 = arith.constant dense<0.000000e+00> : vector<8x128xf32>
    %150 = tpu.matmul %149, %148, %cst_103 {dimension_numbers = #tpu.dot_dimension_numbers<[1], [0], [0], [1], [0, 0, 1, 1], [], []>} : vector<8x8xf32>, vector<8x128xf32>, vector<8x128xf32> -> vector<8x128xf32>
    %151 = arith.addf %144, %150 : vector<8x128xf32>
    %c0_104 = arith.constant 0 : index
    %c34 = arith.constant 34 : index
    %152 = vector.load %arg10[%c0_104, %c34] : memref<8x176xf32, #tpu.memory_space<vmem>>, vector<8x128xf32>
    %c19 = arith.constant 19 : index
    %c0_105 = arith.constant 0 : index
    %153 = vector.load %arg6[%c19, %c0_105] : memref<25x128xf32, #tpu.memory_space<vmem>>, vector<1x128xf32>
    %154 = vector.broadcast %153 : vector<1x128xf32> to vector<8x128xf32>
    %155 = arith.mulf %152, %154 : vector<8x128xf32>
    %c152 = arith.constant 152 : index
    %c0_106 = arith.constant 0 : index
    %156 = vector.load %arg4[%c152, %c0_106] : memref<200x8xf32, #tpu.memory_space<vmem>>, vector<8x8xf32>
    %cst_107 = arith.constant dense<0.000000e+00> : vector<8x128xf32>
    %157 = tpu.matmul %156, %155, %cst_107 {dimension_numbers = #tpu.dot_dimension_numbers<[1], [0], [0], [1], [0, 0, 1, 1], [], []>} : vector<8x8xf32>, vector<8x128xf32>, vector<8x128xf32> -> vector<8x128xf32>
    %158 = arith.addf %151, %157 : vector<8x128xf32>
    %c0_108 = arith.constant 0 : index
    %c38 = arith.constant 38 : index
    %159 = vector.load %arg10[%c0_108, %c38] : memref<8x176xf32, #tpu.memory_space<vmem>>, vector<8x128xf32>
    %c20 = arith.constant 20 : index
    %c0_109 = arith.constant 0 : index
    %160 = vector.load %arg6[%c20, %c0_109] : memref<25x128xf32, #tpu.memory_space<vmem>>, vector<1x128xf32>
    %161 = vector.broadcast %160 : vector<1x128xf32> to vector<8x128xf32>
    %162 = arith.mulf %159, %161 : vector<8x128xf32>
    %c160 = arith.constant 160 : index
    %c0_110 = arith.constant 0 : index
    %163 = vector.load %arg4[%c160, %c0_110] : memref<200x8xf32, #tpu.memory_space<vmem>>, vector<8x8xf32>
    %cst_111 = arith.constant dense<0.000000e+00> : vector<8x128xf32>
    %164 = tpu.matmul %163, %162, %cst_111 {dimension_numbers = #tpu.dot_dimension_numbers<[1], [0], [0], [1], [0, 0, 1, 1], [], []>} : vector<8x8xf32>, vector<8x128xf32>, vector<8x128xf32> -> vector<8x128xf32>
    %165 = arith.addf %158, %164 : vector<8x128xf32>
    %c0_112 = arith.constant 0 : index
    %c39 = arith.constant 39 : index
    %166 = vector.load %arg10[%c0_112, %c39] : memref<8x176xf32, #tpu.memory_space<vmem>>, vector<8x128xf32>
    %c21 = arith.constant 21 : index
    %c0_113 = arith.constant 0 : index
    %167 = vector.load %arg6[%c21, %c0_113] : memref<25x128xf32, #tpu.memory_space<vmem>>, vector<1x128xf32>
    %168 = vector.broadcast %167 : vector<1x128xf32> to vector<8x128xf32>
    %169 = arith.mulf %166, %168 : vector<8x128xf32>
    %c168 = arith.constant 168 : index
    %c0_114 = arith.constant 0 : index
    %170 = vector.load %arg4[%c168, %c0_114] : memref<200x8xf32, #tpu.memory_space<vmem>>, vector<8x8xf32>
    %cst_115 = arith.constant dense<0.000000e+00> : vector<8x128xf32>
    %171 = tpu.matmul %170, %169, %cst_115 {dimension_numbers = #tpu.dot_dimension_numbers<[1], [0], [0], [1], [0, 0, 1, 1], [], []>} : vector<8x8xf32>, vector<8x128xf32>, vector<8x128xf32> -> vector<8x128xf32>
    %172 = arith.addf %165, %171 : vector<8x128xf32>
    %c0_116 = arith.constant 0 : index
    %c40_117 = arith.constant 40 : index
    %173 = vector.load %arg10[%c0_116, %c40_117] : memref<8x176xf32, #tpu.memory_space<vmem>>, vector<8x128xf32>
    %c22_118 = arith.constant 22 : index
    %c0_119 = arith.constant 0 : index
    %174 = vector.load %arg6[%c22_118, %c0_119] : memref<25x128xf32, #tpu.memory_space<vmem>>, vector<1x128xf32>
    %175 = vector.broadcast %174 : vector<1x128xf32> to vector<8x128xf32>
    %176 = arith.mulf %173, %175 : vector<8x128xf32>
    %c176 = arith.constant 176 : index
    %c0_120 = arith.constant 0 : index
    %177 = vector.load %arg4[%c176, %c0_120] : memref<200x8xf32, #tpu.memory_space<vmem>>, vector<8x8xf32>
    %cst_121 = arith.constant dense<0.000000e+00> : vector<8x128xf32>
    %178 = tpu.matmul %177, %176, %cst_121 {dimension_numbers = #tpu.dot_dimension_numbers<[1], [0], [0], [1], [0, 0, 1, 1], [], []>} : vector<8x8xf32>, vector<8x128xf32>, vector<8x128xf32> -> vector<8x128xf32>
    %179 = arith.addf %172, %178 : vector<8x128xf32>
    %c0_122 = arith.constant 0 : index
    %c41 = arith.constant 41 : index
    %180 = vector.load %arg10[%c0_122, %c41] : memref<8x176xf32, #tpu.memory_space<vmem>>, vector<8x128xf32>
    %c23_123 = arith.constant 23 : index
    %c0_124 = arith.constant 0 : index
    %181 = vector.load %arg6[%c23_123, %c0_124] : memref<25x128xf32, #tpu.memory_space<vmem>>, vector<1x128xf32>
    %182 = vector.broadcast %181 : vector<1x128xf32> to vector<8x128xf32>
    %183 = arith.mulf %180, %182 : vector<8x128xf32>
    %c184 = arith.constant 184 : index
    %c0_125 = arith.constant 0 : index
    %184 = vector.load %arg4[%c184, %c0_125] : memref<200x8xf32, #tpu.memory_space<vmem>>, vector<8x8xf32>
    %cst_126 = arith.constant dense<0.000000e+00> : vector<8x128xf32>
    %185 = tpu.matmul %184, %183, %cst_126 {dimension_numbers = #tpu.dot_dimension_numbers<[1], [0], [0], [1], [0, 0, 1, 1], [], []>} : vector<8x8xf32>, vector<8x128xf32>, vector<8x128xf32> -> vector<8x128xf32>
    %186 = arith.addf %179, %185 : vector<8x128xf32>
    %c0_127 = arith.constant 0 : index
    %c42 = arith.constant 42 : index
    %187 = vector.load %arg10[%c0_127, %c42] : memref<8x176xf32, #tpu.memory_space<vmem>>, vector<8x128xf32>
    %c24_128 = arith.constant 24 : index
    %c0_129 = arith.constant 0 : index
    %188 = vector.load %arg6[%c24_128, %c0_129] : memref<25x128xf32, #tpu.memory_space<vmem>>, vector<1x128xf32>
    %189 = vector.broadcast %188 : vector<1x128xf32> to vector<8x128xf32>
    %190 = arith.mulf %187, %189 : vector<8x128xf32>
    %c192 = arith.constant 192 : index
    %c0_130 = arith.constant 0 : index
    %191 = vector.load %arg4[%c192, %c0_130] : memref<200x8xf32, #tpu.memory_space<vmem>>, vector<8x8xf32>
    %cst_131 = arith.constant dense<0.000000e+00> : vector<8x128xf32>
    %192 = tpu.matmul %191, %190, %cst_131 {dimension_numbers = #tpu.dot_dimension_numbers<[1], [0], [0], [1], [0, 0, 1, 1], [], []>} : vector<8x8xf32>, vector<8x128xf32>, vector<8x128xf32> -> vector<8x128xf32>
    %193 = arith.addf %186, %192 : vector<8x128xf32>
    %c0_132 = arith.constant 0 : index
    %c0_133 = arith.constant 0 : index
    %194 = vector.load %arg5[%c0_132, %c0_133] : memref<8x1xf32, #tpu.memory_space<vmem>>, vector<8x1xf32>
    %195 = vector.broadcast %194 : vector<8x1xf32> to vector<8x128xf32>
    %196 = arith.addf %193, %195 : vector<8x128xf32>
    %c0_134 = arith.constant 0 : index
    %c24_135 = arith.constant 24 : index
    %197 = vector.load %arg10[%c0_134, %c24_135] : memref<8x176xf32, #tpu.memory_space<vmem>>, vector<8x128xf32>
    tpu.vector_store %arg10[%c0_134, %c24_135], %196 {strides = array<i32>} : memref<8x176xf32, #tpu.memory_space<vmem>>, vector<8x128xf32>,
    %c0_136 = arith.constant 0 : index
    %c25_137 = arith.constant 25 : index
    %198 = vector.load %arg10[%c0_136, %c25_137] : memref<8x176xf32, #tpu.memory_space<vmem>>, vector<8x128xf32>
    %199 = arith.maximumf %196, %198 : vector<8x128xf32>
    %c0_138 = arith.constant 0 : index
    %c24_139 = arith.constant 24 : index
    %200 = vector.load %arg10[%c0_138, %c24_139] : memref<8x176xf32, #tpu.memory_space<vmem>>, vector<8x128xf32>
    tpu.vector_store %arg10[%c0_138, %c24_139], %199 {strides = array<i32>} : memref<8x176xf32, #tpu.memory_space<vmem>>, vector<8x128xf32>,
    %c0_140 = arith.constant 0 : index
    %c32_141 = arith.constant 32 : index
    %201 = vector.load %arg10[%c0_140, %c32_141] : memref<8x176xf32, #tpu.memory_space<vmem>>, vector<8x128xf32>
    %202 = arith.maximumf %199, %201 : vector<8x128xf32>
    %cst_142 = arith.constant 0.000000e+00 : f32
    %203 = vector.broadcast %cst_142 : f32 to vector<8x128xf32>
    %204 = arith.maximumf %202, %203 : vector<8x128xf32>
    %c0_143 = arith.constant 0 : index
    %c24_144 = arith.constant 24 : index
    %205 = vector.load %arg10[%c0_143, %c24_144] : memref<8x176xf32, #tpu.memory_space<vmem>>, vector<8x128xf32>
    tpu.vector_store %arg10[%c0_143, %c24_144], %204 {strides = array<i32>} : memref<8x176xf32, #tpu.memory_space<vmem>>, vector<8x128xf32>,
    %c0_145 = arith.constant 0 : index
    %c24_146 = arith.constant 24 : index
    %206 = vector.load %arg10[%c0_145, %c24_146] : memref<8x176xf32, #tpu.memory_space<vmem>>, vector<8x64xf32>
    %c0_147 = arith.constant 0 : index
    %c0_148 = arith.constant 0 : index
    %207 = vector.load %arg8[%c0_147, %c0_148] : memref<1x10xf32, #tpu.memory_space<vmem>>, vector<1x10xf32>
    %208 = vector.extract_strided_slice %206 {offsets = [0, 0], sizes = [1, 64], strides = [1, 1]} : vector<8x64xf32> to vector<1x64xf32>
    %c0_149 = arith.constant 0 : index
    %c0_150 = arith.constant 0 : index
    %209 = vector.load %arg7[%c0_149, %c0_150] : memref<384x10xf32, #tpu.memory_space<vmem>>, vector<64x10xf32>
    %cst_151 = arith.constant dense<0.000000e+00> : vector<1x10xf32>
    %210 = tpu.matmul %208, %209, %cst_151 {dimension_numbers = #tpu.dot_dimension_numbers<[1], [0], [0], [1], [0, 0, 1, 1], [], []>} : vector<1x64xf32>, vector<64x10xf32>, vector<1x10xf32> -> vector<1x10xf32>
    %211 = arith.addf %207, %210 : vector<1x10xf32>
    %212 = vector.extract_strided_slice %206 {offsets = [1, 0], sizes = [1, 64], strides = [1, 1]} : vector<8x64xf32> to vector<1x64xf32>
    %c64_152 = arith.constant 64 : index
    %c0_153 = arith.constant 0 : index
    %213 = vector.load %arg7[%c64_152, %c0_153] : memref<384x10xf32, #tpu.memory_space<vmem>>, vector<64x10xf32>
    %cst_154 = arith.constant dense<0.000000e+00> : vector<1x10xf32>
    %214 = tpu.matmul %212, %213, %cst_154 {dimension_numbers = #tpu.dot_dimension_numbers<[1], [0], [0], [1], [0, 0, 1, 1], [], []>} : vector<1x64xf32>, vector<64x10xf32>, vector<1x10xf32> -> vector<1x10xf32>
    %215 = arith.addf %211, %214 : vector<1x10xf32>
    %216 = vector.extract_strided_slice %206 {offsets = [2, 0], sizes = [1, 64], strides = [1, 1]} : vector<8x64xf32> to vector<1x64xf32>
    %c128_155 = arith.constant 128 : index
    %c0_156 = arith.constant 0 : index
    %217 = vector.load %arg7[%c128_155, %c0_156] : memref<384x10xf32, #tpu.memory_space<vmem>>, vector<64x10xf32>
    %cst_157 = arith.constant dense<0.000000e+00> : vector<1x10xf32>
    %218 = tpu.matmul %216, %217, %cst_157 {dimension_numbers = #tpu.dot_dimension_numbers<[1], [0], [0], [1], [0, 0, 1, 1], [], []>} : vector<1x64xf32>, vector<64x10xf32>, vector<1x10xf32> -> vector<1x10xf32>
    %219 = arith.addf %215, %218 : vector<1x10xf32>
    %220 = vector.extract_strided_slice %206 {offsets = [3, 0], sizes = [1, 64], strides = [1, 1]} : vector<8x64xf32> to vector<1x64xf32>
    %c192_158 = arith.constant 192 : index
    %c0_159 = arith.constant 0 : index
    %221 = vector.load %arg7[%c192_158, %c0_159] : memref<384x10xf32, #tpu.memory_space<vmem>>, vector<64x10xf32>
    %cst_160 = arith.constant dense<0.000000e+00> : vector<1x10xf32>
    %222 = tpu.matmul %220, %221, %cst_160 {dimension_numbers = #tpu.dot_dimension_numbers<[1], [0], [0], [1], [0, 0, 1, 1], [], []>} : vector<1x64xf32>, vector<64x10xf32>, vector<1x10xf32> -> vector<1x10xf32>
    %223 = arith.addf %219, %222 : vector<1x10xf32>
    %224 = vector.extract_strided_slice %206 {offsets = [4, 0], sizes = [1, 64], strides = [1, 1]} : vector<8x64xf32> to vector<1x64xf32>
    %c256 = arith.constant 256 : index
    %c0_161 = arith.constant 0 : index
    %225 = vector.load %arg7[%c256, %c0_161] : memref<384x10xf32, #tpu.memory_space<vmem>>, vector<64x10xf32>
    %cst_162 = arith.constant dense<0.000000e+00> : vector<1x10xf32>
    %226 = tpu.matmul %224, %225, %cst_162 {dimension_numbers = #tpu.dot_dimension_numbers<[1], [0], [0], [1], [0, 0, 1, 1], [], []>} : vector<1x64xf32>, vector<64x10xf32>, vector<1x10xf32> -> vector<1x10xf32>
    %227 = arith.addf %223, %226 : vector<1x10xf32>
    %228 = vector.extract_strided_slice %206 {offsets = [5, 0], sizes = [1, 64], strides = [1, 1]} : vector<8x64xf32> to vector<1x64xf32>
    %c320 = arith.constant 320 : index
    %c0_163 = arith.constant 0 : index
    %229 = vector.load %arg7[%c320, %c0_163] : memref<384x10xf32, #tpu.memory_space<vmem>>, vector<64x10xf32>
    %cst_164 = arith.constant dense<0.000000e+00> : vector<1x10xf32>
    %230 = tpu.matmul %228, %229, %cst_164 {dimension_numbers = #tpu.dot_dimension_numbers<[1], [0], [0], [1], [0, 0, 1, 1], [], []>} : vector<1x64xf32>, vector<64x10xf32>, vector<1x10xf32> -> vector<1x10xf32>
    %231 = arith.addf %227, %230 : vector<1x10xf32>
    %c0_165 = arith.constant 0 : index
    %c0_166 = arith.constant 0 : index
    %232 = vector.load %arg9[%c0_165, %c0_166] : memref<2x10xf32, #tpu.memory_space<vmem>>, vector<1x10xf32>
    tpu.vector_store %arg9[%c0_165, %c0_166], %231 {strides = array<i32>} : memref<2x10xf32, #tpu.memory_space<vmem>>, vector<1x10xf32>,
    %c0_167 = arith.constant 0 : index
    %c88_168 = arith.constant 88 : index
    %233 = vector.load %arg10[%c0_167, %c88_168] : memref<8x176xf32, #tpu.memory_space<vmem>>, vector<8x64xf32>
    %c0_169 = arith.constant 0 : index
    %c0_170 = arith.constant 0 : index
    %234 = vector.load %arg8[%c0_169, %c0_170] : memref<1x10xf32, #tpu.memory_space<vmem>>, vector<1x10xf32>
    %235 = vector.extract_strided_slice %233 {offsets = [0, 0], sizes = [1, 64], strides = [1, 1]} : vector<8x64xf32> to vector<1x64xf32>
    %c0_171 = arith.constant 0 : index
    %c0_172 = arith.constant 0 : index
    %236 = vector.load %arg7[%c0_171, %c0_172] : memref<384x10xf32, #tpu.memory_space<vmem>>, vector<64x10xf32>
    %cst_173 = arith.constant dense<0.000000e+00> : vector<1x10xf32>
    %237 = tpu.matmul %235, %236, %cst_173 {dimension_numbers = #tpu.dot_dimension_numbers<[1], [0], [0], [1], [0, 0, 1, 1], [], []>} : vector<1x64xf32>, vector<64x10xf32>, vector<1x10xf32> -> vector<1x10xf32>
    %238 = arith.addf %234, %237 : vector<1x10xf32>
    %239 = vector.extract_strided_slice %233 {offsets = [1, 0], sizes = [1, 64], strides = [1, 1]} : vector<8x64xf32> to vector<1x64xf32>
    %c64_174 = arith.constant 64 : index
    %c0_175 = arith.constant 0 : index
    %240 = vector.load %arg7[%c64_174, %c0_175] : memref<384x10xf32, #tpu.memory_space<vmem>>, vector<64x10xf32>
    %cst_176 = arith.constant dense<0.000000e+00> : vector<1x10xf32>
    %241 = tpu.matmul %239, %240, %cst_176 {dimension_numbers = #tpu.dot_dimension_numbers<[1], [0], [0], [1], [0, 0, 1, 1], [], []>} : vector<1x64xf32>, vector<64x10xf32>, vector<1x10xf32> -> vector<1x10xf32>
    %242 = arith.addf %238, %241 : vector<1x10xf32>
    %243 = vector.extract_strided_slice %233 {offsets = [2, 0], sizes = [1, 64], strides = [1, 1]} : vector<8x64xf32> to vector<1x64xf32>
    %c128_177 = arith.constant 128 : index
    %c0_178 = arith.constant 0 : index
    %244 = vector.load %arg7[%c128_177, %c0_178] : memref<384x10xf32, #tpu.memory_space<vmem>>, vector<64x10xf32>
    %cst_179 = arith.constant dense<0.000000e+00> : vector<1x10xf32>
    %245 = tpu.matmul %243, %244, %cst_179 {dimension_numbers = #tpu.dot_dimension_numbers<[1], [0], [0], [1], [0, 0, 1, 1], [], []>} : vector<1x64xf32>, vector<64x10xf32>, vector<1x10xf32> -> vector<1x10xf32>
    %246 = arith.addf %242, %245 : vector<1x10xf32>
    %247 = vector.extract_strided_slice %233 {offsets = [3, 0], sizes = [1, 64], strides = [1, 1]} : vector<8x64xf32> to vector<1x64xf32>
    %c192_180 = arith.constant 192 : index
    %c0_181 = arith.constant 0 : index
    %248 = vector.load %arg7[%c192_180, %c0_181] : memref<384x10xf32, #tpu.memory_space<vmem>>, vector<64x10xf32>
    %cst_182 = arith.constant dense<0.000000e+00> : vector<1x10xf32>
    %249 = tpu.matmul %247, %248, %cst_182 {dimension_numbers = #tpu.dot_dimension_numbers<[1], [0], [0], [1], [0, 0, 1, 1], [], []>} : vector<1x64xf32>, vector<64x10xf32>, vector<1x10xf32> -> vector<1x10xf32>
    %250 = arith.addf %246, %249 : vector<1x10xf32>
    %251 = vector.extract_strided_slice %233 {offsets = [4, 0], sizes = [1, 64], strides = [1, 1]} : vector<8x64xf32> to vector<1x64xf32>
    %c256_183 = arith.constant 256 : index
    %c0_184 = arith.constant 0 : index
    %252 = vector.load %arg7[%c256_183, %c0_184] : memref<384x10xf32, #tpu.memory_space<vmem>>, vector<64x10xf32>
    %cst_185 = arith.constant dense<0.000000e+00> : vector<1x10xf32>
    %253 = tpu.matmul %251, %252, %cst_185 {dimension_numbers = #tpu.dot_dimension_numbers<[1], [0], [0], [1], [0, 0, 1, 1], [], []>} : vector<1x64xf32>, vector<64x10xf32>, vector<1x10xf32> -> vector<1x10xf32>
    %254 = arith.addf %250, %253 : vector<1x10xf32>
    %255 = vector.extract_strided_slice %233 {offsets = [5, 0], sizes = [1, 64], strides = [1, 1]} : vector<8x64xf32> to vector<1x64xf32>
    %c320_186 = arith.constant 320 : index
    %c0_187 = arith.constant 0 : index
    %256 = vector.load %arg7[%c320_186, %c0_187] : memref<384x10xf32, #tpu.memory_space<vmem>>, vector<64x10xf32>
    %cst_188 = arith.constant dense<0.000000e+00> : vector<1x10xf32>
    %257 = tpu.matmul %255, %256, %cst_188 {dimension_numbers = #tpu.dot_dimension_numbers<[1], [0], [0], [1], [0, 0, 1, 1], [], []>} : vector<1x64xf32>, vector<64x10xf32>, vector<1x10xf32> -> vector<1x10xf32>
    %258 = arith.addf %254, %257 : vector<1x10xf32>
    %c1_189 = arith.constant 1 : index
    %c0_190 = arith.constant 0 : index
    %259 = vector.load %arg9[%c1_189, %c0_190] : memref<2x10xf32, #tpu.memory_space<vmem>>, vector<1x10xf32>
    tpu.vector_store %arg9[%c1_189, %c0_190], %258 {strides = array<i32>} : memref<2x10xf32, #tpu.memory_space<vmem>>, vector<1x10xf32>,
    return
  }
  func.func @transform_0(%arg0: i32) -> (i32, i32) {
    %c0_i32 = arith.constant 0 : i32
    %c0_i32_0 = arith.constant 0 : i32
    %c0_i32_1 = arith.constant 0 : i32
    return %c0_i32, %c0_i32_0 : i32, i32
  }
  func.func @transform_1(%arg0: i32) -> (i32, i32) {
    %c0_i32 = arith.constant 0 : i32
    %c0_i32_0 = arith.constant 0 : i32
    %c0_i32_1 = arith.constant 0 : i32
    return %c0_i32, %c0_i32_0 : i32, i32
  }
  func.func @transform_2(%arg0: i32) -> (i32, i32) {
    %c0_i32 = arith.constant 0 : i32
    %c0_i32_0 = arith.constant 0 : i32
    %c0_i32_1 = arith.constant 0 : i32
    return %c0_i32, %c0_i32_0 : i32, i32
  }
  func.func @transform_3(%arg0: i32) -> (i32, i32) {
    %c0_i32 = arith.constant 0 : i32
    %c0_i32_0 = arith.constant 0 : i32
    %c0_i32_1 = arith.constant 0 : i32
    return %c0_i32, %c0_i32_0 : i32, i32
  }
  func.func @transform_4(%arg0: i32) -> (i32, i32) {
    %c0_i32 = arith.constant 0 : i32
    %c0_i32_0 = arith.constant 0 : i32
    %c0_i32_1 = arith.constant 0 : i32
    return %c0_i32, %c0_i32_0 : i32, i32
  }
  func.func @transform_5(%arg0: i32) -> (i32, i32) {
    %c0_i32 = arith.constant 0 : i32
    %c0_i32_0 = arith.constant 0 : i32
    %c0_i32_1 = arith.constant 0 : i32
    return %c0_i32, %c0_i32_0 : i32, i32
  }
  func.func @transform_6(%arg0: i32) -> (i32, i32) {
    %c0_i32 = arith.constant 0 : i32
    %c0_i32_0 = arith.constant 0 : i32
    %c0_i32_1 = arith.constant 0 : i32
    return %c0_i32, %c0_i32_0 : i32, i32
  }
  func.func @transform_7(%arg0: i32) -> (i32, i32) {
    %c0_i32 = arith.constant 0 : i32
    %c0_i32_0 = arith.constant 0 : i32
    %c0_i32_1 = arith.constant 0 : i32
    return %c0_i32, %c0_i32_0 : i32, i32
  }
  func.func @transform_8(%arg0: i32) -> (i32, i32) {
    %c0_i32 = arith.constant 0 : i32
    %c0_i32_0 = arith.constant 0 : i32
    %c0_i32_1 = arith.constant 0 : i32
    return %c0_i32, %c0_i32_0 : i32, i32
  }
}

</mosaic_0001>

<bundles_post_ra>
// kernel: simple_classifier_forward.1
= control target key start
LH: loop header
LB: loop body
LE: loop exit
PB: predicated region body
PF: predicated region fallthrough
CT: control target
= control target key end

     0   :  { %v2017_v8 = vmov 0   ;;  %vm83_vm0 = vcmask 850944   ;;  %s2922_s0 = inlined_call_operand.vmem [shape: f32[104,512], index: 0, kind: input, shape index: {}]   ;;  %s2923_s1 = inlined_call_operand.vmem [shape: f32[8,104], index: 1, kind: input, shape index: {}]   ;;  %s2924_s2 = inlined_call_operand.vmem [shape: f32[8,1], index: 2, kind: input, shape index: {}]   ;;  %s2925_s3 = inlined_call_operand.vmem [shape: f32[200,8], index: 3, kind: input, shape index: {}]   ;;  %s2926_s4 = inlined_call_operand.vmem [shape: f32[8,1], index: 4, kind: input, shape index: {}]   ;;  %s2927_s5 = inlined_call_operand.vmem [shape: f32[25,128], index: 5, kind: input, shape index: {}]   ;;  %s2928_s6 = inlined_call_operand.vmem [shape: f32[384,10], index: 6, kind: input, shape index: {}]   ;;  %s2929_s7 = inlined_call_operand.vmem [shape: f32[1,10], index: 7, kind: input, shape index: {}]   ;;  %s2930_s8 = inlined_call_operand.hbm [shape: f32[2,10], index: 8, kind: output, shape index: {}]  }
   0x1   :  { %v81_v0 = vld [vmem:[%s2922_s0 + $0x190] sm:$0xff]  ;;  %v82_v1 = vld [vmem:[%s2922_s0 + $0x198] sm:$0xff]  ;;  %v79_v6 = vld [vmem:[%s2922_s0 + $0x180] sm:$0xff]  ;;  %1839 = vset.pattern.permute.xlu0 %v2017_v8  ;;  %1965 = vset.pattern.permute.xlu1 %v2017_v8 }
   0x2   :  { %v77_v2 = vld [vmem:[%s2922_s0 + $0x170] sm:$0xff]  ;;  %130 = vmatpush.msra.mxu2 %v81_v0  ;;  %150 = vmatpush.msra.mxu3 %v82_v1  ;;  %v78_v3 = vld [vmem:[%s2922_s0 + $0x178] sm:$0xff]  ;;  %v80_v7 = vld [vmem:[%s2922_s0 + $0x188] sm:$0xff] }
   0x3   :  { %v73_v4 = vld [vmem:[%s2922_s0 + $0x150] sm:$0xff]  ;;  %v74_v5 = vld [vmem:[%s2922_s0 + $0x158] sm:$0xff]  ;;  %v75_v9 = vld [vmem:[%s2922_s0 + $0x160] sm:$0xff]  ;;  %90 = vmatpush.msra.mxu0 %v79_v6  ;;  %110 = vmatpush.msra.mxu1 %v80_v7 }
   0x4   :  { %131 = vmatpush.msra.mxu2 %v77_v2  ;;  %151 = vmatpush.msra.mxu3 %v78_v3  ;;  %v76_v10 = vld [vmem:[%s2922_s0 + $0x168] sm:$0xff]  ;;  %v69_v11 = vld [vmem:[%s2922_s0 + $0x130] sm:$0xff]  ;;  %v70_v12 = vld [vmem:[%s2922_s0 + $0x138] sm:$0xff] }
   0x5   :  { %v71_v13 = vld [vmem:[%s2922_s0 + $0x140] sm:$0xff]  ;;  %v72_v14 = vld [vmem:[%s2922_s0 + $0x148] sm:$0xff]  ;;  %91 = vmatpush.msra.mxu0 %v75_v9  ;;  %111 = vmatpush.msra.mxu1 %v76_v10  ;;  %v65_v15 = vld [vmem:[%s2922_s0 + $0x110] sm:$0xff] }
   0x6   :  { %132 = vmatpush.msra.mxu2 %v73_v4  ;;  %152 = vmatpush.msra.mxu3 %v74_v5  ;;  %v66_v16 = vld [vmem:[%s2922_s0 + $0x118] sm:$0xff]  ;;  %v67_v17 = vld [vmem:[%s2922_s0 + $0x120] sm:$0xff]  ;;  %v68_v18 = vld [vmem:[%s2922_s0 + $0x128] sm:$0xff] }
   0x7   :  { %92 = vmatpush.msra.mxu0 %v71_v13  ;;  %112 = vmatpush.msra.mxu1 %v72_v14  ;;  %v61_v19 = vld [vmem:[%s2922_s0 + $0xf0] sm:$0xff]  ;;  %v62_v20 = vld [vmem:[%s2922_s0 + $0xf8] sm:$0xff]  ;;  %v63_v21 = vld [vmem:[%s2922_s0 + $0x100] sm:$0xff] }
   0x8   :  { %133 = vmatpush.msra.mxu2 %v69_v11  ;;  %153 = vmatpush.msra.mxu3 %v70_v12  ;;  %v64_v22 = vld [vmem:[%s2922_s0 + $0x108] sm:$0xff]  ;;  %v57_v23 = vld [vmem:[%s2922_s0 + $0xd0] sm:$0xff]  ;;  %v58_v24 = vld [vmem:[%s2922_s0 + $0xd8] sm:$0xff] }
   0x9   :  { %93 = vmatpush.msra.mxu0 %v67_v17  ;;  %113 = vmatpush.msra.mxu1 %v68_v18  ;;  %v59_v25 = vld [vmem:[%s2922_s0 + $0xe0] sm:$0xff]  ;;  %v60_v26 = vld [vmem:[%s2922_s0 + $0xe8] sm:$0xff]  ;;  %v53_v27 = vld [vmem:[%s2922_s0 + $0xb0] sm:$0xff] }
   0xa   :  { %134 = vmatpush.msra.mxu2 %v65_v15  ;;  %154 = vmatpush.msra.mxu3 %v66_v16  ;;  %v54_v28 = vld [vmem:[%s2922_s0 + $0xb8] sm:$0xff]  ;;  %v55_v29 = vld [vmem:[%s2922_s0 + $0xc0] sm:$0xff]  ;;  %v56_v30 = vld [vmem:[%s2922_s0 + $0xc8] sm:$0xff] }
   0xb   :  { %94 = vmatpush.msra.mxu0 %v63_v21  ;;  %114 = vmatpush.msra.mxu1 %v64_v22  ;;  %v49_v31 = vld [vmem:[%s2922_s0 + $0x90] sm:$0xff]  ;;  %v50_v32 = vld [vmem:[%s2922_s0 + $0x98] sm:$0xff]  ;;  %v51_v33 = vld [vmem:[%s2922_s0 + $0xa0] sm:$0xff] }
   0xc   :  { %135 = vmatpush.msra.mxu2 %v61_v19  ;;  %155 = vmatpush.msra.mxu3 %v62_v20  ;;  %v52_v34 = vld [vmem:[%s2922_s0 + $0xa8] sm:$0xff]  ;;  %v45_v35 = vld [vmem:[%s2922_s0 + $0x70] sm:$0xff]  ;;  %v46_v36 = vld [vmem:[%s2922_s0 + $0x78] sm:$0xff] }
   0xd   :  { %95 = vmatpush.msra.mxu0 %v59_v25  ;;  %115 = vmatpush.msra.mxu1 %v60_v26  ;;  %v41_v37 = vld [vmem:[%s2922_s0 + $0x50] sm:$0xff]  ;;  %v42_v38 = vld [vmem:[%s2922_s0 + $0x58] sm:$0xff]  ;;  %v47_v39 = vld [vmem:[%s2922_s0 + $0x80] sm:$0xff] }
   0xe   :  { %136 = vmatpush.msra.mxu2 %v57_v23  ;;  %156 = vmatpush.msra.mxu3 %v58_v24  ;;  %v48_v40 = vld [vmem:[%s2922_s0 + $0x88] sm:$0xff]  ;;  %v37_v41 = vld [vmem:[%s2922_s0 + $0x30] sm:$0xff]  ;;  %v38_v42 = vld [vmem:[%s2922_s0 + $0x38] sm:$0xff] }
   0xf   :  { %96 = vmatpush.msra.mxu0 %v55_v29  ;;  %116 = vmatpush.msra.mxu1 %v56_v30  ;;  %v43_v43 = vld [vmem:[%s2922_s0 + $0x60] sm:$0xff]  ;;  %v44_v44 = vld [vmem:[%s2922_s0 + $0x68] sm:$0xff]  ;;  %v33_v45 = vld [vmem:[%s2922_s0 + $0x10] sm:$0xff] }
  0x10   :  { %137 = vmatpush.msra.mxu2 %v53_v27  ;;  %157 = vmatpush.msra.mxu3 %v54_v28  ;;  %v34_v46 = vld [vmem:[%s2922_s0 + $0x18] sm:$0xff]  ;;  %v39_v47 = vld [vmem:[%s2922_s0 + $0x40] sm:$0xff]  ;;  %v40_v49 = vld [vmem:[%s2922_s0 + $0x48] sm:$0xff] }
  0x11   :  { %97 = vmatpush.msra.mxu0 %v51_v33  ;;  %117 = vmatpush.msra.mxu1 %v52_v34  ;;  %v30_v48 = vld [vmem:[%s2923_s1] sm:$0xff]  ;;  %v36_v51 = vld [vmem:[%s2922_s0 + $0x28] sm:$0xff] }
  0x12   :  { %138 = vmatpush.msra.mxu2 %v49_v31  ;;  %158 = vmatpush.msra.mxu3 %v50_v32  ;;  %v35_v50 = vld [vmem:[%s2922_s0 + $0x20] sm:$0xff]  ;;  %v32_v55 = vld [vmem:[%s2922_s0 + $0x8] sm:$0xff] }
  0x13   :  { %98 = vmatpush.msra.mxu0 %v47_v39  ;;  %118 = vmatpush.msra.mxu1 %v48_v40  ;;  %v1966_v52 = vld [vmem:[%s2927_s5 + $0x2] ss:$0 sm:$0xff] }
  0x14   :  { %139 = vmatpush.msra.mxu2 %v45_v35  ;;  %159 = vmatpush.msra.mxu3 %v46_v36  ;;  %v170_v53 = vld [vmem:[%s2924_s2] sm:$0xff]  ;;  %s2018_s2 = smov 8  }
  0x15   :  { %99 = vmatpush.msra.mxu0 %v43_v43  ;;  %119 = vmatpush.msra.mxu1 %v44_v44  ;;  %v31_v54 = vld [vmem:[%s2922_s0] sm:$0xff] }
  0x16   :  { %140 = vmatpush.msra.mxu2 %v41_v37  ;;  %160 = vmatpush.msra.mxu3 %v42_v38 }
  0x17   :  { %100 = vmatpush.msra.mxu0 %v39_v47  ;;  %120 = vmatpush.msra.mxu1 %v40_v49 }
  0x18   :  { %141 = vmatpush.msra.mxu2 %v37_v41  ;;  %161 = vmatpush.msra.mxu3 %v38_v42 }
  0x19   :  { %101 = vmatpush.msra.mxu0 %v35_v50  ;;  %121 = vmatpush.msra.mxu1 %v36_v51 }
  0x1a   :  { %142 = vmatpush.msra.mxu2 %v33_v45  ;;  %162 = vmatpush.msra.mxu3 %v34_v46 }
  0x1b   :  { %1747 = vmatmul.msk.f32.vlgmr.msra.gmra.mxu2 %vm83_vm0, %v30_v48  ;;  %1748 = vmatmul.msk.f32.vlgmr.msra.gmra.mxu3 %vm83_vm0, %v30_v48 }
  0x1c   :  { %173 = vperm.xlu0 %1839, %v170_v53   ;;  %277 = vrot.lane.b32.xlu1 %v1966_v52, %s2018_s2 }
  0x1d   :  { %13 = vsyncpa [#allocation4], 0  ;;  %102 = vmatpush.msra.mxu0 %v31_v54  ;;  %122 = vmatpush.msra.mxu1 %v32_v55  ;;  %v1967_v56 = vld [vmem:[%s2927_s5 + $0x1] ss:$0 sm:$0xff]  ;;  %s2019_s27 = smov 7   ;;  %s2020_s30 = smov 10  }
  0x1e   :  { %1745 = vmatmul.msk.f32.vlgmr.msra.gmra.mxu0 %vm83_vm0, %v30_v48  ;;  %1746 = vmatmul.msk.f32.vlgmr.msra.gmra.mxu1 %vm83_vm0, %v30_v48  ;;  %v1968_v57 = vld [vmem:[%s2927_s5 + $0x4] ss:$0 sm:$0xff]  ;;  %v1973_v58 = vld [vmem:[%s2927_s5 + $0x6] ss:$0 sm:$0xff]  ;;  %v1974_v59 = vld [vmem:[%s2927_s5 + $0x3] ss:$0 sm:$0xff] }
  0x1f   :  { %s2021_s13 = smov 15   ;;  %s2022_s14 = smov 9   ;;  %v1969_v60 = vld [vmem:[%s2927_s5 + $0xa] ss:$0 sm:$0xff]  ;;  %v1976_v61 = vld [vmem:[%s2927_s5 + $0x5] ss:$0 sm:$0xff] }
  0x20   :  { %319 = vrot.lane.b32.xlu2 %v1974_v59, %s2022_s14  ;;  %s2023_s17 = smov 22   ;;  %s2024_s20 = smov 14   ;;  %v1970_v62 = vld [vmem:[%s2927_s5 + $0x9] ss:$0 sm:$0xff]  ;;  %v1971_v63 = vld [vmem:[%s2927_s5 + $0xf] ss:$0 sm:$0xff] }
  0x21   :  { %s2025_s22 = smov 18   ;;  %s2026_s25 = smov 30   ;;  %v1972_v0 = vld [vmem:[%s2927_s5 + $0x10] ss:$0 sm:$0xff]  ;;  %v1975_v1 = vld [vmem:[%s2927_s5 + $0x16] ss:$0 sm:$0xff] }
  0x22   :  { %s2027_s0 = smov 31   ;;  %s2028_s29 = smov 40   ;;  %v1977_v2 = vld [vmem:[%s2927_s5 + $0x17] ss:$0 sm:$0xff]  ;;  %v1978_v3 = vld [vmem:[%s2927_s5] ss:$0 sm:$0xff] }
  0x23   :  { %v1979_v4 = vld [vmem:[%s2927_s5 + $0xb] ss:$0 sm:$0xff]  ;;  %s2029_s14 = smov 41   ;;  %s2030_s15 = smov 6   ;;  %v1980_v5 = vld [vmem:[%s2927_s5 + $0x15] ss:$0 sm:$0xff] }
  0x24   :  { %203 = vrot.lane.b32.xlu1 %v1967_v56, %s2019_s27  ;;  %445 = vrot.lane.b32.xlu0 %v1973_v58, %s2021_s13  ;;  %s2031_s16 = smov 23   ;;  %v1981_v6 = vld [vmem:[%s2927_s5 + $0x7] ss:$0 sm:$0xff]  ;;  %s2032_s1 = smov 39   ;;  %v1982_v7 = vld [vmem:[%s2927_s5 + $0x18] ss:$0 sm:$0xff] }
  0x25   :  { %s2033_s21 = smov 16   ;;  %v1983_v8 = vld [vmem:[%s2927_s5 + $0x8] ss:$0 sm:$0xff]  ;;  %s2034_s2 = smov 42   ;;  %v1985_v9 = vld [vmem:[%s2927_s5 + $0xe] ss:$0 sm:$0xff] }
  0x26   :  { %s2035_s26 = smov 17   ;;  %s2036_s28 = smov 26   ;;  %v1987_v10 = vld [vmem:[%s2927_s5 + $0xd] ss:$0 sm:$0xff]  ;;  %v1989_v20 = vld [vmem:[%s2927_s5 + $0x13] ss:$0 sm:$0xff] }
  0x27   :  { %s2037_s10 = smov 25   ;;  %s2038_s13 = smov 24   ;;  %v1984_v22 = vld [vmem:[%s2927_s5 + $0xc] ss:$0 sm:$0xff]  ;;  %v1986_v23 = vld [vmem:[%s2927_s5 + $0x12] ss:$0 sm:$0xff] }
  0x28   :  { %194 = vrot.lane.b32.xlu2 %v1978_v3, %s2030_s15  ;;  %s2040_s19 = smov 33   ;;  %v1988_v24 = vld [vmem:[%s2927_s5 + $0x11] ss:$0 sm:$0xff]  ;;  %v1990_v25 = vld [vmem:[%s2927_s5 + $0x14] ss:$0 sm:$0xff]  ;;  %s2042_s24 = smov 38  }
  0x29   :  { %vm179_vm1 = vcmask 392192   ;;  %v2043_v26 = vmov 0.0   ;;  %vm185_vm2 = vcmask 1047744   ;;  %vm187_vm3 = vcmask 195584   ;;  %s2044_s5 = smov 114   ;;  %s2049_s27 = smov 121  }
  0x2a   :  { %178 = vst [vmem:[#allocation2] sm:$0xff] %v2043_v26  ;;  %s2052_s9 = smov 122   ;;  %s2054_s11 = smov 111   ;;  %vm289_vm4 = vcmask 982016   ;;  %vm218_vm5 = vcmask 64512   ;;  %vm215_vm6 = vcmask 990208  }
  0x2b   :  { %180 = vst.msk [vmem:[#allocation2 + $0x8] sm:$0xff] %vm179_vm1, %v2043_v26  ;;  %s2055_s12 = smov 118   ;;  %s2057_s15 = smov 102   ;;  %vm248_vm7 = vcmask 998400   ;;  %vm415_vm8 = vcmask 932864   ;;  %vm331_vm9 = vcmask 973824  }
  0x2c   :  { %361 = vrot.lane.b32.xlu1 %v1968_v57, %s2020_s30  ;;  %403 = vrot.lane.b32.xlu0 %v1976_v61, %s2024_s20  ;;  %s2051_s30 = smov 112   ;;  %s2060_s18 = smov 103   ;;  %vm373_vm10 = vcmask 965632   ;;  %vm457_vm11 = vcmask 924672   ;;  %vm625_vm12 = vcmask 867328   ;;  %vm499_vm13 = vcmask 916480  }
  0x2d   :  { %s2062_s20 = smov 94   ;;  %s2066_s23 = smov 88   ;;  %vm583_vm14 = vcmask 900096   ;;  %vm667_vm15 = vcmask 859136   ;;  %vm541_vm1 = vcmask 908288  }
  0x30   :  { %487 = vrot.lane.b32.xlu2 %v1981_v6, %s2033_s21  ;;  %s2041_s21 = smov 32  }
  0x34   :  { %613 = vrot.lane.b32.xlu1 %v1969_v60, %s2023_s17  ;;  %655 = vrot.lane.b32.xlu0 %v1979_v4, %s2031_s16  ;;  %s2058_s16 = smov 106   ;;  %s2059_s17 = smov 87  }
  0x38   :  { %529 = vrot.lane.b32.xlu2 %v1983_v8, %s2035_s26  ;;  %s2047_s26 = smov 105  }
  0x3c   :  { %571 = vrot.lane.b32.xlu1 %v1970_v62, %s2025_s22  ;;  %s2065_s22 = smov 90  }
  0x40   :  { %780 = vrot.lane.b32.xlu2 %v1985_v9, %s2036_s28  ;;  %s2050_s28 = smov 104  }
  0x44   :  { %822 = vrot.lane.b32.xlu1 %v1971_v63, %s2026_s25  ;;  %s2045_s25 = smov 119  }
  0x48   :  { %738 = vrot.lane.b32.xlu2 %v1987_v10, %s2037_s10  ;;  %s2053_s10 = smov 95  }
  0x4c   :  { %864 = vrot.lane.b32.xlu1 %v1972_v0, %s2027_s0  ;;  %s2048_s0 = smov 113  }
  0x54   :  { %1116 = vrot.lane.b32.xlu1 %v1975_v1, %s2028_s29 }
  0x5c   :  { %1158 = vrot.lane.b32.xlu1 %v1977_v2, %s2029_s14  ;;  %s2039_s14 = smov 34  }
  0x5d   :  { %990 = vrot.lane.b32.xlu2 %v1989_v20, %s2039_s14  ;;  %s2056_s14 = smov 96  }
  0x64   :  { %1074 = vrot.lane.b32.xlu1 %v1980_v5, %s2032_s1  ;;  %s2063_s1 = smov 98  }
  0x6c   :  { %1200 = vrot.lane.b32.xlu1 %v1982_v7, %s2034_s2  ;;  %s2046_s2 = smov 120  }
  0x7a   :  { %v320_v33 = vpop.permute.xlu2 %319 }
  0x82   :  { %v195_v36 = vpop.permute.xlu2 %194 }
  0x8a   :  { %v488_v49 = vpop.permute.xlu2 %487 }
  0x8e   :  { %v174_v17 = vpop.permute.xlu0 %173  ;;  %v278_v27 = vpop.permute.xlu1 %277 }
  0x92   :  { %v530_v61 = vpop.permute.xlu2 %529 }
  0x96   :  { %v446_v28 = vpop.permute.xlu0 %445  ;;  %v204_v29 = vpop.permute.xlu1 %203 }
  0x9b   :  { %v104_v11 = vpop.f32.mrf.mxu0  ;;  %v124_v12 = vpop.f32.mrf.mxu1 }
  0x9c   :  { %v167_v13 = vmax.f32 %v104_v11, %v124_v12 }
  0x9e   :  { %v144_v14 = vpop.f32.mrf.mxu2  ;;  %v164_v15 = vpop.f32.mrf.mxu3 }
  0x9f   :  { %v168_v16 = vmax.f32 %v144_v14, %v164_v15  ;;  %v404_v30 = vpop.permute.xlu0 %403  ;;  %v2359_v31 = vpop.permute.xlu1 %361 }
  0xa0   :  { %v781_v15 = vpop.permute.xlu2 %780 }
  0xa1   :  { %v169_v18 = vmax.f32 %v167_v13, %v168_v16 }
  0xa3   :  { %v176_v19 = vadd.f32 %v174_v17, %v169_v18 }
  0xa5   :  { %v177_v21 = vmax.f32 %v176_v19, 0.0 }
  0xa7   :  { %182 = vrot.lane.b32.xlu0 %v177_v21, %s2038_s13  ;;  %v656_v32 = vpop.permute.xlu0 %655  ;;  %v2361_v34 = vpop.permute.xlu1 %613 }
  0xaf   :  { %697 = vrot.lane.b32.xlu0 %v1984_v22, %s2038_s13  ;;  %v2365_v37 = vpop.permute.xlu1 %571 }
  0xb7   :  { %948 = vrot.lane.b32.xlu0 %v1986_v23, %s2040_s19  ;;  %v2379_v52 = vpop.permute.xlu1 %822  ;;  %s2061_s19 = smov 110  }
  0xbf   :  { %906 = vrot.lane.b32.xlu0 %v1988_v24, %s2041_s21  ;;  %v2391_v4 = vpop.permute.xlu1 %864  ;;  %s2064_s21 = smov 97  }
  0xc7   :  { %1032 = vrot.lane.b32.xlu0 %v1990_v25, %s2042_s24  ;;  %v2402_v17 = vpop.permute.xlu1 %1116  ;;  %s2067_s24 = smov 86  }
 0x119   :  { %v183_v35 = vpop.permute.xlu0 %182 }
 0x11a   :  { %186 = vst.msk [vmem:[#allocation2] sm:$0xff] %vm185_vm2, %v183_v35 }
 0x11b   :  { %188 = vst.msk [vmem:[#allocation2 + $0x8] sm:$0xff] %vm187_vm3, %v183_v35 }
 0x121   :  { %v2367_v38 = vld [vmem:[#allocation2] sm:$0xff]  ;;  %v698_v53 = vpop.permute.xlu0 %697 }
 0x122   :  { %v2369_v39 = vld [vmem:[#allocation2 + $0x8] sm:$0xff]  ;;  %v406_v40 = vmul.f32 %v404_v30, %v2367_v38  ;;  %v322_v42 = vmul.f32 %v320_v33, %v2367_v38  ;;  %v280_v44 = vmul.f32 %v278_v27, %v2367_v38  ;;  %v658_v50 = vmul.f32 %v656_v32, %v2367_v38 }
 0x123   :  { %v407_v41 = vmul.f32 %v404_v30, %v2369_v39  ;;  %v323_v43 = vmul.f32 %v320_v33, %v2369_v39  ;;  %v281_v45 = vmul.f32 %v278_v27, %v2369_v39  ;;  %v659_v51 = vmul.f32 %v656_v32, %v2369_v39  ;;  %v739_v27 = vpop.permute.xlu2 %738 }
 0x124   :  { %v448_v54 = vmul.f32 %v446_v28, %v2367_v38  ;;  %v449_v55 = vmul.f32 %v446_v28, %v2369_v39  ;;  %v206_v56 = vmul.f32 %v204_v29, %v2367_v38  ;;  %v207_v57 = vmul.f32 %v204_v29, %v2369_v39 }
 0x125   :  { %v1875_v46 = vpack.i.bf16 %v407_v41, %v406_v40  ;;  %v1850_v47 = vpack.i.bf16 %v323_v43, %v322_v42  ;;  %v1840_v48 = vpack.i.bf16 %v281_v45, %v280_v44  ;;  %v1890_v58 = vpack.i.bf16 %v659_v51, %v658_v50 }
 0x126   :  { %v1860_v59 = vpack.i.bf16 %v449_v55, %v448_v54  ;;  %v1845_v60 = vpack.i.bf16 %v207_v57, %v206_v56  ;;  %v700_v62 = vmul.f32 %v698_v53, %v2367_v38  ;;  %v701_v63 = vmul.f32 %v698_v53, %v2369_v39 }
 0x127   :  { %1876 = vrot.lane.b32.xlu1 %v1875_v46, %s2044_s5  ;;  %1851 = vrot.lane.b32.xlu0 %v1850_v47, %s2045_s25  ;;  %v490_v0 = vmul.f32 %v488_v49, %v2367_v38  ;;  %v491_v1 = vmul.f32 %v488_v49, %v2369_v39  ;;  %v197_v2 = vmul.f32 %v195_v36, %v2367_v38  ;;  %s2068_s5 = smov 89  }
 0x128   :  { %1841 = vrot.lane.b32.xlu2 %v1840_v48, %s2046_s2  ;;  %v198_v3 = vmul.f32 %v195_v36, %v2369_v39  ;;  %v1905_v6 = vpack.i.bf16 %v701_v63, %v700_v62  ;;  %v532_v11 = vmul.f32 %v530_v61, %v2367_v38  ;;  %v533_v12 = vmul.f32 %v530_v61, %v2369_v39  ;;  %s1736_s2 = sshll.u32 %s2930_s8, 4  ;;  %s1737_s2 = int_to_ptr.hbm [resolvable:$true] %s1736_s2 }
 0x129   :  { %v949_v5 = vpop.permute.xlu0 %948  ;;  %v1870_v7 = vpack.i.bf16 %v491_v1, %v490_v0  ;;  %v364_v13 = vmul.f32 %v2359_v31, %v2367_v38  ;;  %v365_v14 = vmul.f32 %v2359_v31, %v2369_v39  ;;  %v783_v23 = vmul.f32 %v781_v15, %v2367_v38  ;;  %v1159_v31 = vpop.permute.xlu1 %1158 }
 0x12a   :  { %v1855_v8 = vpack.i.bf16 %v198_v3, %v197_v2  ;;  %v951_v9 = vmul.f32 %v949_v5, %v2367_v38  ;;  %v952_v10 = vmul.f32 %v949_v5, %v2369_v39  ;;  %v1885_v19 = vpack.i.bf16 %v533_v12, %v532_v11 }
 0x12b   :  { %v1865_v20 = vpack.i.bf16 %v365_v14, %v364_v13  ;;  %v784_v24 = vmul.f32 %v781_v15, %v2369_v39  ;;  %v616_v25 = vmul.f32 %v2361_v34, %v2367_v38  ;;  %v617_v26 = vmul.f32 %v2361_v34, %v2369_v39  ;;  %v991_v44 = vpop.permute.xlu2 %990  ;;  %v199_v15 = vld [vmem:[%s2925_s3] sm:$0xff] }
 0x12c   :  { %v1920_v16 = vpack.i.bf16 %v952_v10, %v951_v9  ;;  %v1161_v32 = vmul.f32 %v1159_v31, %v2367_v38  ;;  %v1162_v33 = vmul.f32 %v1159_v31, %v2369_v39  ;;  %v741_v35 = vmul.f32 %v739_v27, %v2367_v38  ;;  %v208_v10 = vld [vmem:[%s2925_s3 + $0x8] sm:$0xff] }
 0x12d   :  { %v1900_v29 = vpack.i.bf16 %v784_v24, %v783_v23  ;;  %v1880_v30 = vpack.i.bf16 %v617_v26, %v616_v25  ;;  %v742_v34 = vmul.f32 %v739_v27, %v2369_v39  ;;  %v574_v36 = vmul.f32 %v2365_v37, %v2367_v38  ;;  %v324_v27 = vld [vmem:[%s2925_s3 + $0x18] sm:$0xff]  ;;  %v408_v31 = vld [vmem:[%s2925_s3 + $0x28] sm:$0xff] }
 0x12e   :  { %v575_v40 = vmul.f32 %v2365_v37, %v2369_v39  ;;  %v1950_v41 = vpack.i.bf16 %v1162_v33, %v1161_v32  ;;  %v993_v45 = vmul.f32 %v991_v44, %v2367_v38  ;;  %v994_v46 = vmul.f32 %v991_v44, %v2369_v39  ;;  %v450_v44 = vld [vmem:[%s2925_s3 + $0x30] sm:$0xff] }
 0x12f   :  { %1891 = vrot.lane.b32.xlu1 %v1890_v58, %s2047_s26  ;;  %1861 = vrot.lane.b32.xlu0 %v1860_v59, %s2048_s0  ;;  %v1915_v42 = vpack.i.bf16 %v742_v34, %v741_v35  ;;  %v825_v47 = vmul.f32 %v2379_v52, %v2367_v38  ;;  %v826_v37 = vmul.f32 %v2379_v52, %v2369_v39 }
 0x130   :  { %1846 = vrot.lane.b32.xlu2 %v1845_v60, %s2049_s27  ;;  %v1895_v43 = vpack.i.bf16 %v575_v40, %v574_v36  ;;  %v1930_v49 = vpack.i.bf16 %v994_v46, %v993_v45  ;;  %v867_v55 = vmul.f32 %v2391_v4, %v2367_v38  ;;  %v868_v56 = vmul.f32 %v2391_v4, %v2369_v39 }
 0x131   :  { %v907_v18 = vpop.permute.xlu0 %906  ;;  %v1075_v48 = vpop.permute.xlu1 %1074  ;;  %v1910_v50 = vpack.i.bf16 %v826_v37, %v825_v47  ;;  %v1119_v61 = vmul.f32 %v2402_v17, %v2367_v38  ;;  %v1120_v62 = vmul.f32 %v2402_v17, %v2369_v39 }
 0x132   :  { %v909_v21 = vmul.f32 %v907_v18, %v2367_v38  ;;  %v910_v22 = vmul.f32 %v907_v18, %v2369_v39  ;;  %v1925_v52 = vpack.i.bf16 %v868_v56, %v867_v55  ;;  %v1077_v1 = vmul.f32 %v1075_v48, %v2367_v38 }
 0x133   :  { %v1940_v0 = vpack.i.bf16 %v1120_v62, %v1119_v61  ;;  %v1078_v2 = vmul.f32 %v1075_v48, %v2369_v39 }
 0x134   :  { %v1935_v28 = vpack.i.bf16 %v910_v22, %v909_v21 }
 0x135   :  { %v1955_v3 = vpack.i.bf16 %v1078_v2, %v1077_v1 }
 0x137   :  { %1906 = vrot.lane.b32.xlu1 %v1905_v6, %s2050_s28  ;;  %1871 = vrot.lane.b32.xlu0 %v1870_v7, %s2051_s30 }
 0x138   :  { %1856 = vrot.lane.b32.xlu2 %v1855_v8, %s2052_s9  ;;  %v282_v8 = vld [vmem:[%s2925_s3 + $0x10] sm:$0xff] }
 0x139   :  { %v1033_v51 = vpop.permute.xlu0 %1032  ;;  %v1201_v58 = vpop.permute.xlu1 %1200 }
 0x13a   :  { %v1035_v53 = vmul.f32 %v1033_v51, %v2367_v38  ;;  %v1036_v54 = vmul.f32 %v1033_v51, %v2369_v39  ;;  %v1203_v59 = vmul.f32 %v1201_v58, %v2367_v38  ;;  %v1204_v60 = vmul.f32 %v1201_v58, %v2369_v39 }
 0x13c   :  { %v1945_v57 = vpack.i.bf16 %v1036_v54, %v1035_v53  ;;  %v1960_v63 = vpack.i.bf16 %v1204_v60, %v1203_v59  ;;  %v576_v54 = vld [vmem:[%s2925_s3 + $0x48] sm:$0xff] }
 0x13f   :  { %1921 = vrot.lane.b32.xlu1 %v1920_v16, %s2053_s10  ;;  %1886 = vrot.lane.b32.xlu0 %v1885_v19, %s2054_s11 }
 0x140   :  { %1866 = vrot.lane.b32.xlu2 %v1865_v20, %s2055_s12 }
 0x147   :  { %1936 = vrot.lane.b32.xlu1 %v1935_v28, %s2056_s14  ;;  %1901 = vrot.lane.b32.xlu0 %v1900_v29, %s2057_s15  ;;  %v366_v28 = vld [vmem:[%s2925_s3 + $0x20] sm:$0xff] }
 0x148   :  { %1881 = vrot.lane.b32.xlu2 %v1880_v30, %s2058_s16 }
 0x14f   :  { %1951 = vrot.lane.b32.xlu1 %v1950_v41, %s2059_s17  ;;  %1916 = vrot.lane.b32.xlu0 %v1915_v42, %s2060_s18 }
 0x150   :  { %1896 = vrot.lane.b32.xlu2 %v1895_v43, %s2061_s19 }
 0x157   :  { %1931 = vrot.lane.b32.xlu0 %v1930_v49, %s2062_s20 }
 0x158   :  { %1911 = vrot.lane.b32.xlu2 %v1910_v50, %s2063_s1 }
 0x15f   :  { %1946 = vrot.lane.b32.xlu0 %v1945_v57, %s2065_s22  ;;  %v492_v57 = vld [vmem:[%s2925_s3 + $0x38] sm:$0xff] }
 0x160   :  { %1926 = vrot.lane.b32.xlu2 %v1925_v52, %s2064_s21  ;;  %v618_v52 = vld [vmem:[%s2925_s3 + $0x50] sm:$0xff] }
 0x167   :  { %1961 = vrot.lane.b32.xlu0 %v1960_v63, %s2067_s24  ;;  %s2069_s24 = smov [#allocation3]  }
 0x168   :  { %1941 = vrot.lane.b32.xlu2 %v1940_v0, %s2066_s23 }
 0x170   :  { %1956 = vrot.lane.b32.xlu2 %v1955_v3, %s2068_s5 }
 0x182   :  { %v1842_v4 = vpop.permute.xlu2 %1841 }
 0x183   :  { %v1844_v5 = vunpack.i.h.bf16 %v1842_v4  ;;  %v1843_v6 = vunpack.i.l.bf16 %v1842_v4 }
 0x185   :  { %v290_v7 = vsel %vm289_vm4, %v1843_v6, %v1844_v5  ;;  %vm834_vm4 = vcmask 801792   ;;  %v534_v6 = vld [vmem:[%s2925_s3 + $0x40] sm:$0xff] }
 0x186   :  { %310 = vmatpush.msrb.mxu2 %v290_v7  ;;  %v660_v7 = vld [vmem:[%s2925_s3 + $0x58] sm:$0xff] }
 0x187   :  { %1751 = vmatmul.msk.f32.vlgmr.msrb.gmra.mxu2 %vm218_vm5, %v282_v8 }
 0x18a   :  { %v1847_v9 = vpop.permute.xlu2 %1846 }
 0x18b   :  { %v1849_v38 = vunpack.i.h.bf16 %v1847_v9  ;;  %v1848_v39 = vunpack.i.l.bf16 %v1847_v9 }
 0x18d   :  { %v216_v11 = vsel %vm215_vm6, %v1848_v39, %v1849_v38  ;;  %vm792_vm6 = vcmask 834560  }
 0x18e   :  { %237 = vmatpush.msrb.mxu0 %v216_v11 }
 0x18f   :  { %1749 = vmatmul.msk.f32.vlgmr.msrb.gmra.mxu0 %vm218_vm5, %v208_v10 }
 0x192   :  { %v1857_v12 = vpop.permute.xlu2 %1856 }
 0x193   :  { %v1859_v13 = vunpack.i.h.bf16 %v1857_v12  ;;  %v1858_v14 = vunpack.i.l.bf16 %v1857_v12 }
 0x195   :  { %v249_v16 = vsel %vm248_vm7, %v1858_v14, %v1859_v13  ;;  %vm876_vm7 = vcmask 793600  }
 0x196   :  { %269 = vmatpush.msrb.mxu1 %v249_v16 }
 0x197   :  { %1750 = vmatmul.msk.f32.vlgmr.msrb.gmra.mxu1 %vm218_vm5, %v199_v15 }
 0x199   :  { %v1877_v17 = vpop.permute.xlu1 %1876  ;;  %v1852_v21 = vpop.permute.xlu0 %1851 }
 0x19a   :  { %v1879_v18 = vunpack.i.h.bf16 %v1877_v17  ;;  %v1878_v19 = vunpack.i.l.bf16 %v1877_v17  ;;  %v1867_v20 = vpop.permute.xlu2 %1866  ;;  %v1854_v24 = vunpack.i.h.bf16 %v1852_v21  ;;  %v1853_v25 = vunpack.i.l.bf16 %v1852_v21  ;;  %v827_v21 = vld [vmem:[%s2925_s3 + $0x78] sm:$0xff] }
 0x19b   :  { %v1869_v22 = vunpack.i.h.bf16 %v1867_v20  ;;  %v1868_v23 = vunpack.i.l.bf16 %v1867_v20 }
 0x19c   :  { %v416_v26 = vsel %vm415_vm8, %v1878_v19, %v1879_v18  ;;  %v332_v29 = vsel %vm331_vm9, %v1853_v25, %v1854_v24  ;;  %vm960_vm8 = vcmask 777216   ;;  %v785_v18 = vld [vmem:[%s2925_s3 + $0x70] sm:$0xff]  ;;  %v702_v19 = vld [vmem:[%s2925_s3 + $0x60] sm:$0xff]  ;;  %vm1128_vm9 = vcmask 719872  }
 0x19d   :  { %v374_v30 = vsel %vm373_vm10, %v1868_v23, %v1869_v22  ;;  %436 = vmatpush.msra.mxu1 %v416_v26  ;;  %352 = vmatpush.msrb.mxu3 %v332_v29  ;;  %v1239_v22 = vld [vmem:[%s2926_s4] sm:$0xff]  ;;  %vm918_vm10 = vcmask 785408  }
 0x19e   :  { %394 = vmatpush.msra.mxu0 %v374_v30  ;;  %1752 = vmatmul.msk.f32.vlgmr.msrb.gmra.mxu3 %vm218_vm5, %v324_v27 }
 0x19f   :  { %1753 = vmatmul.msk.f32.vlgmr.msra.gmra.mxu0 %vm218_vm5, %v366_v28  ;;  %1754 = vmatmul.msk.f32.vlgmr.msra.gmra.mxu1 %vm218_vm5, %v408_v31 }
 0x1a0   :  { %1242 = vperm.xlu1 %1965, %v1239_v22  }
 0x1a1   :  { %v1892_v32 = vpop.permute.xlu1 %1891  ;;  %v1862_v35 = vpop.permute.xlu0 %1861 }
 0x1a2   :  { %v1882_v33 = vpop.permute.xlu2 %1881  ;;  %v1864_v40 = vunpack.i.h.bf16 %v1862_v35  ;;  %v1863_v41 = vunpack.i.l.bf16 %v1862_v35  ;;  %v1894_v46 = vunpack.i.h.bf16 %v1892_v32  ;;  %v1893_v47 = vunpack.i.l.bf16 %v1892_v32  ;;  %v953_v35 = vld [vmem:[%s2925_s3 + $0x90] sm:$0xff] }
 0x1a3   :  { %v1884_v34 = vunpack.i.h.bf16 %v1882_v33  ;;  %v1883_v36 = vunpack.i.l.bf16 %v1882_v33  ;;  %v743_v33 = vld [vmem:[%s2925_s3 + $0x68] sm:$0xff] }
 0x1a4   :  { %v458_v42 = vsel %vm457_vm11, %v1863_v41, %v1864_v40  ;;  %v668_v58 = vsel %vm667_vm15, %v1893_v47, %v1894_v46  ;;  %vm1002_vm11 = vcmask 769024   ;;  %vm1212_vm15 = vcmask 703488  }
 0x1a5   :  { %v626_v43 = vsel %vm625_vm12, %v1883_v36, %v1884_v34  ;;  %478 = vmatpush.msra.mxu2 %v458_v42  ;;  %v869_v36 = vld [vmem:[%s2925_s3 + $0x80] sm:$0xff]  ;;  %vm1086_vm12 = vcmask 728064  }
 0x1a6   :  { %1755 = vmatmul.msk.f32.vlgmr.msra.gmra.mxu2 %vm218_vm5, %v450_v44 }
 0x1a7   :  { %646 = vmatpush.msrb.mxu2 %v626_v43 }
 0x1a9   :  { %v1907_v45 = vpop.permute.xlu1 %1906  ;;  %v1872_v48 = vpop.permute.xlu0 %1871 }
 0x1aa   :  { %v1897_v37 = vpop.permute.xlu2 %1896  ;;  %v1874_v51 = vunpack.i.h.bf16 %v1872_v48  ;;  %v1873_v53 = vunpack.i.l.bf16 %v1872_v48  ;;  %v1909_v59 = vunpack.i.h.bf16 %v1907_v45  ;;  %v1908_v60 = vunpack.i.l.bf16 %v1907_v45  ;;  %v995_v48 = vld [vmem:[%s2925_s3 + $0x98] sm:$0xff] }
 0x1ab   :  { %v1899_v49 = vunpack.i.h.bf16 %v1897_v37  ;;  %v1898_v50 = vunpack.i.l.bf16 %v1897_v37 }
 0x1ac   :  { %v500_v55 = vsel %vm499_vm13, %v1873_v53, %v1874_v51  ;;  %v709_v8 = vsel %vm83_vm0, %v1908_v60, %v1909_v59  ;;  %vm750_vm0 = vcmask 842752   ;;  %vm1170_vm13 = vcmask 711680   ;;  %v911_v51 = vld [vmem:[%s2925_s3 + $0x88] sm:$0xff]  ;;  %v1121_v53 = vld [vmem:[%s2925_s3 + $0xb0] sm:$0xff] }
 0x1ad   :  { %v584_v56 = vsel %vm583_vm14, %v1898_v50, %v1899_v49  ;;  %520 = vmatpush.msra.mxu3 %v500_v55  ;;  %vm1044_vm14 = vcmask 736256   ;;  %v1079_v60 = vld [vmem:[%s2925_s3 + $0xa8] sm:$0xff] }
 0x1ae   :  { %604 = vmatpush.msrb.mxu1 %v584_v56  ;;  %1756 = vmatmul.msk.f32.vlgmr.msra.gmra.mxu3 %vm218_vm5, %v492_v57 }
 0x1af   :  { %688 = vmatpush.msrb.mxu3 %v668_v58  ;;  %1758 = vmatmul.msk.f32.vlgmr.msrb.gmra.mxu1 %vm218_vm5, %v576_v54  ;;  %v1163_v58 = vld [vmem:[%s2925_s3 + $0xb8] sm:$0xff] }
 0x1b0   :  { %1759 = vmatmul.msk.f32.vlgmr.msrb.gmra.mxu2 %vm218_vm5, %v618_v52  ;;  %v1037_v52 = vld [vmem:[%s2925_s3 + $0xa0] sm:$0xff] }
 0x1b1   :  { %v1887_v62 = vpop.permute.xlu0 %1886  ;;  %v1922_v1 = vpop.permute.xlu1 %1921 }
 0x1b2   :  { %v1912_v61 = vpop.permute.xlu2 %1911  ;;  %v1889_v2 = vunpack.i.h.bf16 %v1887_v62  ;;  %v1888_v3 = vunpack.i.l.bf16 %v1887_v62  ;;  %v1924_v9 = vunpack.i.h.bf16 %v1922_v1  ;;  %v1923_v38 = vunpack.i.l.bf16 %v1922_v1 }
 0x1b3   :  { %v1914_v63 = vunpack.i.h.bf16 %v1912_v61  ;;  %v1913_v0 = vunpack.i.l.bf16 %v1912_v61 }
 0x1b4   :  { %v542_v4 = vsel %vm541_vm1, %v1888_v3, %v1889_v2  ;;  %v961_v20 = vsel %vm960_vm8, %v1923_v38, %v1924_v9 }
 0x1b5   :  { %v835_v5 = vsel %vm834_vm4, %v1913_v0, %v1914_v63  ;;  %562 = vmatpush.msrb.mxu0 %v542_v4  ;;  %v1205_v0 = vld [vmem:[%s2925_s3 + $0xc0] sm:$0xff] }
 0x1b6   :  { %855 = vmatpush.msra.mxu3 %v835_v5  ;;  %1757 = vmatmul.msk.f32.vlgmr.msrb.gmra.mxu0 %vm218_vm5, %v534_v6 }
 0x1b7   :  { %729 = vmatpush.msra.mxu0 %v709_v8  ;;  %1760 = vmatmul.msk.f32.vlgmr.msrb.gmra.mxu3 %vm218_vm5, %v660_v7 }
 0x1b9   :  { %v1902_v10 = vpop.permute.xlu0 %1901  ;;  %v1937_v15 = vpop.permute.xlu1 %1936 }
 0x1ba   :  { %v1927_v39 = vpop.permute.xlu2 %1926  ;;  %v1904_v13 = vunpack.i.h.bf16 %v1902_v10  ;;  %v1903_v14 = vunpack.i.l.bf16 %v1902_v10  ;;  %v1939_v23 = vunpack.i.h.bf16 %v1937_v15  ;;  %v1938_v24 = vunpack.i.l.bf16 %v1937_v15 }
 0x1bb   :  { %v1929_v11 = vunpack.i.h.bf16 %v1927_v39  ;;  %v1928_v12 = vunpack.i.l.bf16 %v1927_v39 }
 0x1bc   :  { %v793_v16 = vsel %vm792_vm6, %v1903_v14, %v1904_v13  ;;  %v919_v34 = vsel %vm918_vm10, %v1938_v24, %v1939_v23 }
 0x1bd   :  { %v877_v17 = vsel %vm876_vm7, %v1928_v12, %v1929_v11  ;;  %813 = vmatpush.msra.mxu2 %v793_v16 }
 0x1be   :  { %897 = vmatpush.msrb.mxu0 %v877_v17  ;;  %1763 = vmatmul.msk.f32.vlgmr.msra.gmra.mxu2 %vm218_vm5, %v785_v18 }
 0x1bf   :  { %981 = vmatpush.msrb.mxu2 %v961_v20  ;;  %1761 = vmatmul.msk.f32.vlgmr.msra.gmra.mxu0 %vm218_vm5, %v702_v19 }
 0x1c0   :  { %1764 = vmatmul.msk.f32.vlgmr.msra.gmra.mxu3 %vm218_vm5, %v827_v21 }
 0x1c1   :  { %v1917_v26 = vpop.permute.xlu0 %1916  ;;  %v1952_v40 = vpop.permute.xlu1 %1951 }
 0x1c2   :  { %v1942_v25 = vpop.permute.xlu2 %1941  ;;  %v1919_v29 = vunpack.i.h.bf16 %v1917_v26  ;;  %v1918_v30 = vunpack.i.l.bf16 %v1917_v26  ;;  %v1954_v41 = vunpack.i.h.bf16 %v1952_v40  ;;  %v1953_v42 = vunpack.i.l.bf16 %v1952_v40 }
 0x1c3   :  { %v1944_v27 = vunpack.i.h.bf16 %v1942_v25  ;;  %v1943_v28 = vunpack.i.l.bf16 %v1942_v25 }
 0x1c4   :  { %v751_v31 = vsel %vm750_vm0, %v1918_v30, %v1919_v29  ;;  %v1171_v54 = vsel %vm1170_vm13, %v1953_v42, %v1954_v41 }
 0x1c5   :  { %v1129_v32 = vsel %vm1128_vm9, %v1943_v28, %v1944_v27  ;;  %771 = vmatpush.msra.mxu1 %v751_v31 }
 0x1c6   :  { %1149 = vmatpush.msra.mxu2 %v1129_v32  ;;  %1762 = vmatmul.msk.f32.vlgmr.msra.gmra.mxu1 %vm218_vm5, %v743_v33 }
 0x1c7   :  { %939 = vmatpush.msrb.mxu1 %v919_v34  ;;  %1767 = vmatmul.msk.f32.vlgmr.msrb.gmra.mxu2 %vm218_vm5, %v953_v35 }
 0x1c8   :  { %1765 = vmatmul.msk.f32.vlgmr.msrb.gmra.mxu0 %vm218_vm5, %v869_v36 }
 0x1c9   :  { %v1932_v44 = vpop.permute.xlu0 %1931 }
 0x1ca   :  { %v1957_v43 = vpop.permute.xlu2 %1956  ;;  %v1934_v47 = vunpack.i.h.bf16 %v1932_v44  ;;  %v1933_v37 = vunpack.i.l.bf16 %v1932_v44 }
 0x1cb   :  { %v1959_v45 = vunpack.i.h.bf16 %v1957_v43  ;;  %v1958_v46 = vunpack.i.l.bf16 %v1957_v43 }
 0x1cc   :  { %v1003_v49 = vsel %vm1002_vm11, %v1933_v37, %v1934_v47 }
 0x1cd   :  { %v1087_v50 = vsel %vm1086_vm12, %v1958_v46, %v1959_v45  ;;  %1023 = vmatpush.msrb.mxu3 %v1003_v49 }
 0x1ce   :  { %1107 = vmatpush.msra.mxu1 %v1087_v50  ;;  %1768 = vmatmul.msk.f32.vlgmr.msrb.gmra.mxu3 %vm218_vm5, %v995_v48 }
 0x1cf   :  { %1191 = vmatpush.msra.mxu3 %v1171_v54  ;;  %1766 = vmatmul.msk.f32.vlgmr.msrb.gmra.mxu1 %vm218_vm5, %v911_v51 }
 0x1d0   :  { %1771 = vmatmul.msk.f32.vlgmr.msra.gmra.mxu2 %vm218_vm5, %v1121_v53 }
 0x1d1   :  { %v1947_v55 = vpop.permute.xlu0 %1946 }
 0x1d2   :  { %v1949_v56 = vunpack.i.h.bf16 %v1947_v55  ;;  %v1948_v57 = vunpack.i.l.bf16 %v1947_v55 }
 0x1d4   :  { %v1045_v59 = vsel %vm1044_vm14, %v1948_v57, %v1949_v56 }
 0x1d5   :  { %1065 = vmatpush.msra.mxu0 %v1045_v59 }
 0x1d6   :  { %1769 = vmatmul.msk.f32.vlgmr.msra.gmra.mxu0 %vm218_vm5, %v1037_v52  ;;  %1772 = vmatmul.msk.f32.vlgmr.msra.gmra.mxu3 %vm218_vm5, %v1163_v58 }
 0x1d7   :  { %1770 = vmatmul.msk.f32.vlgmr.msra.gmra.mxu1 %vm218_vm5, %v1079_v60 }
 0x1d9   :  { %v1962_v61 = vpop.permute.xlu0 %1961 }
 0x1da   :  { %v1964_v62 = vunpack.i.h.bf16 %v1962_v61  ;;  %v1963_v63 = vunpack.i.l.bf16 %v1962_v61 }
 0x1dc   :  { %v1213_v1 = vsel %vm1212_vm15, %v1963_v63, %v1964_v62 }
 0x1dd   :  { %1233 = vmatpush.msrb.mxu0 %v1213_v1 }
 0x1de   :  { %1773 = vmatmul.msk.f32.vlgmr.msrb.gmra.mxu0 %vm218_vm5, %v1205_v0  ;;  %vm1494_vm5 = vcmask 73728  }
 0x20a   :  { %v312_v5 = vpop.f32.mrf.mxu2 }
 0x20c   :  { %v239_v3 = vpop.f32.mrf.mxu0 }
 0x212   :  { %v1243_v50 = vpop.permute.xlu1 %1242 }
 0x214   :  { %v271_v2 = vpop.f32.mrf.mxu1 }
 0x215   :  { %v272_v4 = vadd.f32 %v271_v2, %v239_v3 }
 0x217   :  { %v315_v6 = vadd.f32 %v312_v5, %v272_v4 }
 0x21c   :  { %v396_v9 = vpop.f32.mrf.mxu0  ;;  %v438_v39 = vpop.f32.mrf.mxu1 }
 0x221   :  { %v354_v7 = vpop.f32.mrf.mxu3 }
 0x222   :  { %v357_v8 = vadd.f32 %v354_v7, %v315_v6 }
 0x224   :  { %v399_v38 = vadd.f32 %v396_v9, %v357_v8 }
 0x226   :  { %v441_v10 = vadd.f32 %v438_v39, %v399_v38  ;;  %v2572_v38 = vld [vmem:[%s2928_s6 + $0x38] sm:$0xff]  ;;  %v2577_v39 = vld [vmem:[%s2928_s6 + $0x30] sm:$0xff] }
 0x227   :  { %1311 = vmatpush.msrb.mxu1 %v2572_v38 }
 0x229   :  { %v480_v11 = vpop.f32.mrf.mxu2  ;;  %1312 = vmatpush.msrb.mxu1 %v2577_v39 }
 0x22a   :  { %v483_v12 = vadd.f32 %v480_v11, %v441_v10  ;;  %v2583_v10 = vld [vmem:[%s2928_s6 + $0x28] sm:$0xff] }
 0x22b   :  { %1313 = vmatpush.msrb.mxu1 %v2583_v10 }
 0x22c   :  { %v606_v16 = vpop.f32.mrf.mxu1 }
 0x231   :  { %v522_v13 = vpop.f32.mrf.mxu3 }
 0x232   :  { %v525_v14 = vadd.f32 %v522_v13, %v483_v12  ;;  %v2589_v13 = vld [vmem:[%s2928_s6 + $0x20] sm:$0xff] }
 0x233   :  { %v564_v15 = vpop.f32.mrf.mxu0  ;;  %v648_v18 = vpop.f32.mrf.mxu2  ;;  %1314 = vmatpush.msrb.mxu1 %v2589_v13 }
 0x234   :  { %v567_v17 = vadd.f32 %v564_v15, %v525_v14  ;;  %v2597_v14 = vld [vmem:[%s2928_s6 + $0x18] sm:$0xff]  ;;  %v2604_v15 = vld [vmem:[%s2928_s6 + $0x10] sm:$0xff] }
 0x235   :  { %1315 = vmatpush.msrb.mxu1 %v2597_v14 }
 0x236   :  { %v609_v19 = vadd.f32 %v606_v16, %v567_v17  ;;  %v2610_v16 = vld [vmem:[%s2928_s6 + $0x8] sm:$0xff] }
 0x237   :  { %1316 = vmatpush.msrb.mxu1 %v2604_v15 }
 0x238   :  { %v651_v20 = vadd.f32 %v648_v18, %v609_v19  ;;  %v2616_v18 = vld [vmem:[%s2928_s6] sm:$0xff] }
 0x239   :  { %1317 = vmatpush.msrb.mxu1 %v2610_v16 }
 0x23a   :  { %v690_v21 = vpop.f32.mrf.mxu3 }
 0x23b   :  { %v693_v22 = vadd.f32 %v690_v21, %v651_v20  ;;  %1318 = vmatpush.msrb.mxu1 %v2616_v18 }
 0x23c   :  { %v731_v23 = vpop.f32.mrf.mxu0 }
 0x23d   :  { %v734_v24 = vadd.f32 %v731_v23, %v693_v22  ;;  %v2632_v23 = vld [vmem:[%s2928_s6 + $0x78] sm:$0xff] }
 0x23e   :  { %1345 = vmatpush.msrb.mxu2 %v2632_v23 }
 0x241   :  { %v815_v25 = vpop.f32.mrf.mxu2 }
 0x243   :  { %v773_v26 = vpop.f32.mrf.mxu1  ;;  %v857_v28 = vpop.f32.mrf.mxu3 }
 0x244   :  { %v776_v27 = vadd.f32 %v773_v26, %v734_v24  ;;  %v2637_v24 = vld [vmem:[%s2928_s6 + $0x70] sm:$0xff]  ;;  %v2649_v26 = vld [vmem:[%s2928_s6 + $0x60] sm:$0xff] }
 0x245   :  { %v899_v30 = vpop.f32.mrf.mxu0  ;;  %1346 = vmatpush.msrb.mxu2 %v2637_v24 }
 0x246   :  { %v818_v29 = vadd.f32 %v815_v25, %v776_v27  ;;  %v2644_v25 = vld [vmem:[%s2928_s6 + $0x68] sm:$0xff]  ;;  %v2654_v27 = vld [vmem:[%s2928_s6 + $0xb8] sm:$0xff] }
 0x247   :  { %1347 = vmatpush.msrb.mxu2 %v2644_v25  ;;  %1379 = vmatpush.msrb.mxu3 %v2654_v27 }
 0x248   :  { %v860_v31 = vadd.f32 %v857_v28, %v818_v29  ;;  %v2661_v28 = vld [vmem:[%s2928_s6 + $0xb0] sm:$0xff]  ;;  %v2666_v29 = vld [vmem:[%s2928_s6 + $0x58] sm:$0xff] }
 0x249   :  { %1348 = vmatpush.msrb.mxu2 %v2649_v26  ;;  %1380 = vmatpush.msrb.mxu3 %v2661_v28 }
 0x24a   :  { %v902_v32 = vadd.f32 %v899_v30, %v860_v31  ;;  %v983_v34 = vpop.f32.mrf.mxu2  ;;  %v2671_v30 = vld [vmem:[%s2928_s6 + $0xa8] sm:$0xff]  ;;  %v2678_v31 = vld [vmem:[%s2928_s6 + $0x50] sm:$0xff] }
 0x24b   :  { %1349 = vmatpush.msrb.mxu2 %v2666_v29  ;;  %1381 = vmatpush.msrb.mxu3 %v2671_v30 }
 0x24c   :  { %v941_v33 = vpop.f32.mrf.mxu1 }
 0x24d   :  { %v944_v35 = vadd.f32 %v941_v33, %v902_v32  ;;  %1350 = vmatpush.msrb.mxu2 %v2678_v31  ;;  %v2686_v32 = vld [vmem:[%s2928_s6 + $0x48] sm:$0xff]  ;;  %v2691_v33 = vld [vmem:[%s2928_s6 + $0xa0] sm:$0xff] }
 0x24e   :  { %1382 = vmatpush.msrb.mxu3 %v2691_v33 }
 0x24f   :  { %v986_v36 = vadd.f32 %v983_v34, %v944_v35  ;;  %v2696_v35 = vld [vmem:[%s2928_s6 + $0x40] sm:$0xff]  ;;  %1351 = vmatpush.msrb.mxu2 %v2686_v32  ;;  %v2703_v34 = vld [vmem:[%s2928_s6 + $0x98] sm:$0xff] }
 0x250   :  { %1383 = vmatpush.msrb.mxu3 %v2703_v34 }
 0x251   :  { %v1025_v40 = vpop.f32.mrf.mxu3  ;;  %1352 = vmatpush.msrb.mxu2 %v2696_v35 }
 0x252   :  { %v1028_v41 = vadd.f32 %v1025_v40, %v986_v36  ;;  %v2708_v36 = vld [vmem:[%s2928_s6 + $0x178] sm:$0xff]  ;;  %v2713_v40 = vld [vmem:[%s2928_s6 + $0x90] sm:$0xff] }
 0x253   :  { %v1067_v42 = vpop.f32.mrf.mxu0  ;;  %v1151_v45 = vpop.f32.mrf.mxu2  ;;  %1481 = vmatpush.msra.mxu2 %v2708_v36  ;;  %1384 = vmatpush.msrb.mxu3 %v2713_v40 }
 0x254   :  { %v1070_v43 = vadd.f32 %v1067_v42, %v1028_v41  ;;  %v1109_v44 = vpop.f32.mrf.mxu1  ;;  %v2718_v41 = vld [vmem:[%s2928_s6 + $0xf8] sm:$0xff]  ;;  %v2725_v42 = vld [vmem:[%s2928_s6 + $0x170] sm:$0xff] }
 0x255   :  { %1413 = vmatpush.msra.mxu0 %v2718_v41  ;;  %1482 = vmatpush.msra.mxu2 %v2725_v42 }
 0x256   :  { %v1112_v46 = vadd.f32 %v1109_v44, %v1070_v43  ;;  %v2730_v43 = vld [vmem:[%s2928_s6 + $0xf0] sm:$0xff]  ;;  %v2737_v44 = vld [vmem:[%s2928_s6 + $0x88] sm:$0xff] }
 0x257   :  { %1414 = vmatpush.msra.mxu0 %v2730_v43  ;;  %1385 = vmatpush.msrb.mxu3 %v2737_v44 }
 0x258   :  { %v1154_v47 = vadd.f32 %v1151_v45, %v1112_v46  ;;  %v2743_v45 = vld [vmem:[%s2928_s6 + $0x168] sm:$0xff]  ;;  %v2752_v46 = vld [vmem:[%s2928_s6 + $0x80] sm:$0xff] }
 0x259   :  { %v1193_v37 = vpop.f32.mrf.mxu3  ;;  %1483 = vmatpush.msra.mxu2 %v2743_v45  ;;  %1386 = vmatpush.msrb.mxu3 %v2752_v46 }
 0x25a   :  { %v1196_v48 = vadd.f32 %v1193_v37, %v1154_v47  ;;  %v2757_v47 = vld [vmem:[%s2928_s6 + $0xe8] sm:$0xff]  ;;  %v2762_v37 = vld [vmem:[%s2928_s6 + $0x138] sm:$0xff] }
 0x25b   :  { %v1235_v49 = vpop.f32.mrf.mxu0  ;;  %1415 = vmatpush.msra.mxu0 %v2757_v47  ;;  %1447 = vmatpush.msra.mxu1 %v2762_v37 }
 0x25c   :  { %v1238_v51 = vadd.f32 %v1235_v49, %v1196_v48  ;;  %v2769_v48 = vld [vmem:[%s2928_s6 + $0x160] sm:$0xff]  ;;  %1525 = vmatpush.msra.mxu3 %v2572_v38 }
 0x25d   :  { %1484 = vmatpush.msra.mxu2 %v2769_v48  ;;  %v2776_v49 = vld [vmem:[%s2928_s6 + $0xe0] sm:$0xff] }
 0x25e   :  { %v1245_v53 = vadd.f32 %v1243_v50, %v1238_v51  ;;  %v2781_v50 = vld [vmem:[%s2928_s6 + $0x130] sm:$0xff]  ;;  %v2786_v51 = vld [vmem:[%s2928_s6 + $0x158] sm:$0xff]  ;;  %1416 = vmatpush.msra.mxu0 %v2776_v49  ;;  %1526 = vmatpush.msra.mxu3 %v2577_v39 }
 0x25f   :  { %1448 = vmatpush.msra.mxu1 %v2781_v50  ;;  %1485 = vmatpush.msra.mxu2 %v2786_v51 }
 0x260   :  { %1247 = vrot.lane.b32.xlu2 %v1245_v53, %s2038_s13  ;;  %1527 = vmatpush.msra.mxu3 %v2583_v10 }
 0x262   :  { %1528 = vmatpush.msra.mxu3 %v2589_v13 }
 0x264   :  { %1529 = vmatpush.msra.mxu3 %v2597_v14 }
 0x266   :  { %1530 = vmatpush.msra.mxu3 %v2604_v15 }
 0x268   :  { %1531 = vmatpush.msra.mxu3 %v2610_v16 }
 0x26a   :  { %1532 = vmatpush.msra.mxu3 %v2616_v18 }
 0x2ba   :  { %v1248_v54 = vpop.permute.xlu2 %1247 }
 0x2bb   :  { %1250 = vst.msk [vmem:[#allocation2] sm:$0xff] %vm185_vm2, %v1248_v54 }
 0x2bc   :  { %1251 = vst.msk [vmem:[#allocation2 + $0x8] sm:$0xff] %vm187_vm3, %v1248_v54  ;;  %v2798_v54 = vld [vmem:[%s2928_s6 + $0x128] sm:$0xff] }
 0x2bd   :  { %1449 = vmatpush.msra.mxu1 %v2798_v54 }
 0x2c2   :  { %v1252_v55 = vld [vmem:[#allocation2] sm:$0xff] }
 0x2c3   :  { %v1253_v56 = vld [vmem:[#allocation2 + $0x8] sm:$0xff]  ;;  %1256 = vrot.lane.b32.xlu0 %v1252_v55, %s2060_s18  ;;  %v2803_v55 = vld [vmem:[%s2928_s6 + $0x150] sm:$0xff] }
 0x2c4   :  { %1258 = vrot.lane.b32.xlu1 %v1253_v56, %s2060_s18  ;;  %v2810_v56 = vld [vmem:[%s2928_s6 + $0xd0] sm:$0xff]  ;;  %1486 = vmatpush.msra.mxu2 %v2803_v55 }
 0x335   :  { %v1257_v57 = vpop.permute.xlu0 %1256 }
 0x336   :  { %v1259_v52 = vpop.permute.xlu1 %1258 }
 0x337   :  { %v1260_v58 = vsel %vm750_vm0, %v1257_v57, %v1259_v52  ;;  %v2817_v57 = vld [vmem:[%s2928_s6 + $0x148] sm:$0xff]  ;;  %v2824_v52 = vld [vmem:[%s2928_s6 + $0x120] sm:$0xff] }
 0x338   :  { %v1262_v59 = vmax.f32 %v1245_v53, %v1260_v58  ;;  %v2793_v53 = vld [vmem:[%s2928_s6 + $0xd8] sm:$0xff]  ;;  %1487 = vmatpush.msra.mxu2 %v2817_v57  ;;  %1450 = vmatpush.msra.mxu1 %v2824_v52 }
 0x339   :  { %1417 = vmatpush.msra.mxu0 %v2793_v53 }
 0x33a   :  { %1264 = vrot.lane.b32.xlu2 %v1262_v59, %s2038_s13 }
 0x33b   :  { %1418 = vmatpush.msra.mxu0 %v2810_v56 }
 0x394   :  { %v1265_v60 = vpop.permute.xlu2 %1264 }
 0x395   :  { %1267 = vst.msk [vmem:[#allocation2] sm:$0xff] %vm185_vm2, %v1265_v60 }
 0x396   :  { %1268 = vst.msk [vmem:[#allocation2 + $0x8] sm:$0xff] %vm187_vm3, %v1265_v60  ;;  %v1429_v60 = vld [vmem:[%s2928_s6 + $0x118] sm:$0xff] }
 0x397   :  { %1451 = vmatpush.msra.mxu1 %v1429_v60 }
 0x39c   :  { %v1269_v61 = vld [vmem:[#allocation2] sm:$0xff] }
 0x39d   :  { %v1270_v62 = vld [vmem:[#allocation2 + $0x8] sm:$0xff]  ;;  %1273 = vrot.lane.b32.xlu0 %v1269_v61, %s2056_s14  ;;  %v2839_v61 = vld [vmem:[%s2928_s6 + $0x140] sm:$0xff] }
 0x39e   :  { %1275 = vrot.lane.b32.xlu1 %v1270_v62, %s2056_s14  ;;  %v1392_v62 = vld [vmem:[%s2928_s6 + $0xc0] sm:$0xff]  ;;  %1488 = vmatpush.msra.mxu2 %v2839_v61 }
 0x40f   :  { %v1274_v63 = vpop.permute.xlu0 %1273 }
 0x410   :  { %v1276_v0 = vpop.permute.xlu1 %1275 }
 0x411   :  { %v1277_v1 = vsel %vm918_vm10, %v1274_v63, %v1276_v0  ;;  %v1428_v63 = vld [vmem:[%s2928_s6 + $0x110] sm:$0xff]  ;;  %v1427_v0 = vld [vmem:[%s2928_s6 + $0x108] sm:$0xff] }
 0x412   :  { %v1279_v2 = vmax.f32 %v1262_v59, %v1277_v1  ;;  %v1393_v59 = vld [vmem:[%s2928_s6 + $0xc8] sm:$0xff]  ;;  %1452 = vmatpush.msra.mxu1 %v1428_v63  ;;  %v1426_v1 = vld [vmem:[%s2928_s6 + $0x100] sm:$0xff] }
 0x413   :  { %1419 = vmatpush.msra.mxu0 %v1393_v59 }
 0x414   :  { %v1280_v3 = vmax.f32 %v1279_v2, 0.0  ;;  %1453 = vmatpush.msra.mxu1 %v1427_v0 }
 0x415   :  { %1420 = vmatpush.msra.mxu0 %v1392_v62 }
 0x416   :  { %1282 = vrot.lane.b32.xlu2 %v1280_v3, %s2038_s13  ;;  %1454 = vmatpush.msra.mxu1 %v1426_v1 }
 0x417   :  { %1563 = vmatpush.msrb.mxu0 %v2632_v23  ;;  %v1288_v23 = vld [vmem:[%s2929_s7] sm:$0x1] }
 0x419   :  { %1564 = vmatpush.msrb.mxu0 %v2637_v24 }
 0x41b   :  { %1565 = vmatpush.msrb.mxu0 %v2644_v25 }
 0x41d   :  { %1566 = vmatpush.msrb.mxu0 %v2649_v26 }
 0x41f   :  { %1567 = vmatpush.msrb.mxu0 %v2666_v29 }
 0x421   :  { %1568 = vmatpush.msrb.mxu0 %v2678_v31 }
 0x423   :  { %1569 = vmatpush.msrb.mxu0 %v2686_v32 }
 0x425   :  { %1570 = vmatpush.msrb.mxu0 %v2696_v35 }
 0x470   :  { %v1283_v4 = vpop.permute.xlu2 %1282 }
 0x471   :  { %1285 = vst.msk [vmem:[#allocation2] sm:$0xff] %vm185_vm2, %v1283_v4  ;;  %vm1300_vm2 = vcmask 523264  }
 0x472   :  { %1286 = vst.msk [vmem:[#allocation2 + $0x8] sm:$0xff] %vm187_vm3, %v1283_v4  ;;  %vm1513_vm3 = vcmask 326656  }
 0x478   :  { %v1496_v5 = vld [vmem:[#allocation2] sm:$0xff] }
 0x479   :  { %1509 = vrot.lane.b32.xlu1 %v1496_v5, %s2028_s29  ;;  %1298 = vrot.lane.b32.xlu2 %v1496_v5, %s2050_s28  ;;  %v1332_v6 = vrot.slane %v1496_v5, 1  ;;  %v1366_v7 = vrot.slane %v1496_v5, 2  ;;  %v1497_v8 = vld [vmem:[#allocation2 + $0x8] sm:$0xff]  ;;  %v1468_v9 = vrot.slane %v1496_v5, 5  ;;  %v1622_v11 = vrot.slane %v1496_v5, 3 }
 0x47a   :  { %v1434_v12 = vrot.slane %v1496_v5, 4  ;;  %v1547_v17 = vrot.slane %v1497_v8, 1  ;;  %v1623_v19 = vrot.slane %v1497_v8, 3  ;;  %v1661_v20 = vrot.slane %v1497_v8, 4 }
 0x47b   :  { %1333 = vrot.lane.b32.xlu0 %v1332_v6, %s2050_s28  ;;  %v1699_v21 = vrot.slane %v1497_v8, 5  ;;  %v1585_v22 = vrot.slane %v1497_v8, 2 }
 0x481   :  { %1511 = vrot.lane.b32.xlu2 %v1497_v8, %s2028_s29  ;;  %1367 = vrot.lane.b32.xlu1 %v1366_v7, %s2050_s28 }
 0x483   :  { %1469 = vrot.lane.b32.xlu0 %v1468_v9, %s2050_s28 }
 0x489   :  { %1624 = vrot.lane.b32.xlu2 %v1622_v11, %s2028_s29  ;;  %1435 = vrot.lane.b32.xlu1 %v1434_v12, %s2050_s28 }
 0x48b   :  { %1401 = vrot.lane.b32.xlu0 %v1622_v11, %s2050_s28  ;;  %s1734_s28 = sshll.u32 %s2069_s24, 4  ;;  %s1735_s28 = int_to_ptr.vmem [resolvable:$true] %s1734_s28 }
 0x491   :  { %1550 = vrot.lane.b32.xlu2 %v1547_v17, %s2028_s29  ;;  %1548 = vrot.lane.b32.xlu1 %v1332_v6, %s2028_s29 }
 0x493   :  { %1626 = vrot.lane.b32.xlu0 %v1623_v19, %s2028_s29 }
 0x499   :  { %1586 = vrot.lane.b32.xlu2 %v1366_v7, %s2028_s29  ;;  %1664 = vrot.lane.b32.xlu1 %v1661_v20, %s2028_s29 }
 0x49b   :  { %1662 = vrot.lane.b32.xlu0 %v1434_v12, %s2028_s29 }
 0x4a1   :  { %1702 = vrot.lane.b32.xlu2 %v1699_v21, %s2028_s29  ;;  %1700 = vrot.lane.b32.xlu1 %v1468_v9, %s2028_s29 }
 0x4a3   :  { %1588 = vrot.lane.b32.xlu0 %v1585_v22, %s2028_s29 }
 0x4d3   :  { %v1299_v58 = vpop.permute.xlu2 %1298 }
 0x4d4   :  { %1774 = vmatmul.msk.f32.vlgmr.msrb.gmra.mxu1 %vm1300_vm2, %v1299_v58 }
 0x4d5   :  { %1601 = vmatpush.msrb.mxu1 %v2654_v27 }
 0x4d7   :  { %1602 = vmatpush.msrb.mxu1 %v2661_v28 }
 0x4d9   :  { %1603 = vmatpush.msrb.mxu1 %v2671_v30 }
 0x4db   :  { %1604 = vmatpush.msrb.mxu1 %v2691_v33  ;;  %v1512_v2 = vpop.permute.xlu2 %1511 }
 0x4dd   :  { %1605 = vmatpush.msrb.mxu1 %v2703_v34 }
 0x4df   :  { %1606 = vmatpush.msrb.mxu1 %v2713_v40 }
 0x4e1   :  { %1607 = vmatpush.msrb.mxu1 %v2737_v44 }
 0x4e3   :  { %1608 = vmatpush.msrb.mxu1 %v2752_v46  ;;  %v1625_v6 = vpop.permute.xlu2 %1624 }
 0x4eb   :  { %v1510_v3 = vpop.permute.xlu1 %1509  ;;  %v1551_v39 = vpop.permute.xlu2 %1550 }
 0x4ec   :  { %v1514_v8 = vsel %vm1513_vm3, %v1510_v3, %v1512_v2 }
 0x4ed   :  { %v1334_v4 = vpop.permute.xlu0 %1333 }
 0x4ee   :  { %1775 = vmatmul.msk.f32.vlgmr.msrb.gmra.mxu2 %vm1300_vm2, %v1334_v4 }
 0x4ef   :  { %1639 = vmatpush.msrb.mxu2 %v2718_v41 }
 0x4f1   :  { %1640 = vmatpush.msrb.mxu2 %v2730_v43 }
 0x4f3   :  { %v1368_v5 = vpop.permute.xlu1 %1367  ;;  %1641 = vmatpush.msrb.mxu2 %v2757_v47  ;;  %v1587_v14 = vpop.permute.xlu2 %1586 }
 0x4f4   :  { %1776 = vmatmul.msk.f32.vlgmr.msrb.gmra.mxu3 %vm1300_vm2, %v1368_v5 }
 0x4f5   :  { %v1470_v7 = vpop.permute.xlu0 %1469  ;;  %1642 = vmatpush.msrb.mxu2 %v2776_v49  ;;  %1677 = vmatpush.msrb.mxu3 %v2762_v37 }
 0x4f6   :  { %1779 = vmatmul.msk.f32.vlgmr.msra.gmra.mxu2 %vm1300_vm2, %v1470_v7 }
 0x4f7   :  { %1643 = vmatpush.msrb.mxu2 %v2793_v53  ;;  %1678 = vmatpush.msrb.mxu3 %v2781_v50 }
 0x4f9   :  { %1644 = vmatpush.msrb.mxu2 %v2810_v56  ;;  %1679 = vmatpush.msrb.mxu3 %v2798_v54 }
 0x4fb   :  { %v1436_v9 = vpop.permute.xlu1 %1435  ;;  %1645 = vmatpush.msrb.mxu2 %v1393_v59  ;;  %1680 = vmatpush.msrb.mxu3 %v2824_v52  ;;  %v1703_v18 = vpop.permute.xlu2 %1702 }
 0x4fc   :  { %1778 = vmatmul.msk.f32.vlgmr.msra.gmra.mxu1 %vm1300_vm2, %v1436_v9  ;;  %1780 = vmatmul.msk.f32.vlgmr.msra.gmra.mxu3 %vm1300_vm2, %v1514_v8 }
 0x4fd   :  { %v1402_v38 = vpop.permute.xlu0 %1401  ;;  %1646 = vmatpush.msrb.mxu2 %v1392_v62  ;;  %1681 = vmatpush.msrb.mxu3 %v1429_v60 }
 0x4fe   :  { %1777 = vmatmul.msk.f32.vlgmr.msra.gmra.mxu0 %vm1300_vm2, %v1402_v38 }
 0x4ff   :  { %1715 = vmatpush.msra.mxu0 %v2708_v36  ;;  %1682 = vmatpush.msrb.mxu3 %v1428_v63  ;;  %v1498_v36 = vld [vmem:[%s2929_s7] sm:$0x1] }
 0x501   :  { %1716 = vmatpush.msra.mxu0 %v2725_v42  ;;  %1683 = vmatpush.msrb.mxu3 %v1427_v0 }
 0x503   :  { %v1549_v10 = vpop.permute.xlu1 %1548  ;;  %1717 = vmatpush.msra.mxu0 %v2743_v45  ;;  %1684 = vmatpush.msrb.mxu3 %v1426_v1 }
 0x504   :  { %v1552_v11 = vsel %vm1513_vm3, %v1549_v10, %v1551_v39 }
 0x505   :  { %v1627_v12 = vpop.permute.xlu0 %1626  ;;  %1718 = vmatpush.msra.mxu0 %v2769_v48 }
 0x506   :  { %v1628_v13 = vsel %vm1513_vm3, %v1625_v6, %v1627_v12  ;;  %1781 = vmatmul.msk.f32.vlgmr.msrb.gmra.mxu0 %vm1300_vm2, %v1552_v11 }
 0x507   :  { %1783 = vmatmul.msk.f32.vlgmr.msrb.gmra.mxu2 %vm1300_vm2, %v1628_v13  ;;  %1719 = vmatpush.msra.mxu0 %v2786_v51 }
 0x509   :  { %1720 = vmatpush.msra.mxu0 %v2803_v55 }
 0x50b   :  { %v1665_v15 = vpop.permute.xlu1 %1664  ;;  %1721 = vmatpush.msra.mxu0 %v2817_v57 }
 0x50d   :  { %v1663_v16 = vpop.permute.xlu0 %1662  ;;  %1722 = vmatpush.msra.mxu0 %v2839_v61 }
 0x50e   :  { %v1666_v17 = vsel %vm1513_vm3, %v1663_v16, %v1665_v15 }
 0x50f   :  { %1784 = vmatmul.msk.f32.vlgmr.msrb.gmra.mxu3 %vm1300_vm2, %v1666_v17 }
 0x513   :  { %v1701_v19 = vpop.permute.xlu1 %1700 }
 0x514   :  { %v1704_v20 = vsel %vm1513_vm3, %v1701_v19, %v1703_v18 }
 0x515   :  { %1785 = vmatmul.msk.f32.vlgmr.msra.gmra.mxu0 %vm1300_vm2, %v1704_v20  ;;  %v1589_v21 = vpop.permute.xlu0 %1588 }
 0x516   :  { %v1590_v22 = vsel %vm1513_vm3, %v1587_v14, %v1589_v21 }
 0x517   :  { %1782 = vmatmul.msk.f32.vlgmr.msrb.gmra.mxu1 %vm1300_vm2, %v1590_v22 }
 0x551   :  { %v1320_v24 = vpop.f32.mrf.mxu1 }
 0x552   :  { %v1323_v26 = vadd.f32 %v1320_v24, %v1288_v23 }
 0x571   :  { %v1354_v25 = vpop.f32.mrf.mxu2 }
 0x572   :  { %v1357_v28 = vadd.f32 %v1354_v25, %v1323_v26 }
 0x577   :  { %v1388_v27 = vpop.f32.mrf.mxu3 }
 0x578   :  { %v1391_v29 = vadd.f32 %v1388_v27, %v1357_v28 }
 0x579   :  { %v1456_v32 = vpop.f32.mrf.mxu1  ;;  %v1490_v35 = vpop.f32.mrf.mxu2 }
 0x57b   :  { %v1422_v30 = vpop.f32.mrf.mxu0 }
 0x57c   :  { %v1425_v31 = vadd.f32 %v1422_v30, %v1391_v29 }
 0x57e   :  { %v1459_v33 = vadd.f32 %v1456_v32, %v1425_v31 }
 0x57f   :  { %v1534_v40 = vpop.f32.mrf.mxu3 }
 0x580   :  { %v1493_v34 = vadd.f32 %v1490_v35, %v1459_v33  ;;  %v1537_v42 = vadd.f32 %v1534_v40, %v1498_v36 }
 0x582   :  { %1495 = vst.msk [vmem:[#allocation3] sm:$0x1] %vm1494_vm5, %v1493_v34 }
 0x583   :  { %v1572_v41 = vpop.f32.mrf.mxu0 }
 0x584   :  { %v1575_v43 = vadd.f32 %v1572_v41, %v1537_v42 }
 0x58a   :  { %v1648_v46 = vpop.f32.mrf.mxu2 }
 0x592   :  { %v1686_v37 = vpop.f32.mrf.mxu3  ;;  %v1724_v49 = vpop.f32.mrf.mxu0 }
 0x594   :  { %v1610_v44 = vpop.f32.mrf.mxu1 }
 0x595   :  { %v1613_v45 = vadd.f32 %v1610_v44, %v1575_v43 }
 0x597   :  { %v1651_v47 = vadd.f32 %v1648_v46, %v1613_v45 }
 0x599   :  { %v1689_v48 = vadd.f32 %v1686_v37, %v1651_v47 }
 0x59b   :  { %v1727_v50 = vadd.f32 %v1724_v49, %v1689_v48 }
 0x59d   :  { %1728 = vst.msk [vmem:[#allocation3 + $0x1] sm:$0x1] %vm1494_vm5, %v1727_v50 }
 0x59e   :  { %1739 = dma.vmem_to_hbm [thread:$0]  %s1735_s28, 32, %s1737_s2, [#allocation4]  }
 0x59f   :  { %2015 = dma.done.wait [#allocation4], 32  }
 0x5a0   :  { %2016 = vsyncadd [#allocation4], 4294967264 }
 0x5a1   :  { %1744 = vsyncpa [#allocation4], 1 }

</bundles_post_ra>
